<compile_context>
chip_gen: v7x
topology: tpu7x:2x2x1
jax: 0.10.0
libtpu: 0.0.40
codegen_flags: <defaults>
</compile_context>

<pallas_src>
import jax
import jax.numpy as jnp
from jax.experimental import pallas as pl
from jax.experimental.pallas import tpu as pltpu

H1 = 512      # linear1_units
H2 = 256      # linear2_units
LANE = 128    # lane-dense padded width for the final layer


def qnetwork_kernel(x_ref, w1_ref, b1_ref, w2_ref, b2_ref, w3_ref, b3_ref,
                    out_ref):
    # bf16 at the MXU inputs, f32 accumulate; bias+ReLU+cast fused so the f32
    # intermediates die immediately.
    x = x_ref[...].astype(jnp.bfloat16)                               # (TB, S)

    h1 = jnp.dot(x, w1_ref[...], preferred_element_type=jnp.float32)  # (TB, H1)
    h1 = jnp.maximum(h1 + b1_ref[...], 0.0).astype(jnp.bfloat16)

    h2 = jnp.dot(h1, w2_ref[...], preferred_element_type=jnp.float32)  # (TB, H2)
    h2 = jnp.maximum(h2 + b2_ref[...], 0.0).astype(jnp.bfloat16)

    q = jnp.dot(h2, w3_ref[...], preferred_element_type=jnp.float32)   # (TB, LANE)
    out_ref[...] = (q + b3_ref[...]).astype(out_ref.dtype)


def _num_tensorcores():
    # v7x exposes 2 TensorCores per chip; v5e/v6e expose 1.  Fall back to 1.
    try:
        return max(1, int(getattr(jax.devices()[0], "num_cores", 1)))
    except Exception:
        return 1


def qnetwork_forward(state, params, action_size):
    """state: (B, state_size) float32.
    params: dict of w1,b1,w2,b2,w3,b3 with bf16 (in, out) weights, f32 (1, out)
    biases; w3/b3 already lane-padded to LANE columns (see init_params).
    Returns (B, action_size) bf16 Q-values."""
    w1, b1 = params["w1"], params["b1"]
    w2, b2 = params["w2"], params["b2"]
    w3, b3 = params["w3"], params["b3"]

    B, S = state.shape

    # 1 grid step (2 on a 2-TC chip so both TensorCores get half the batch).
    n_steps = min(_num_tensorcores(), 2)
    if n_steps > 1:
        TB = pl.cdiv(B, n_steps)
        TB = ((TB + 7) // 8) * 8          # sublane-aligned tile for a 2-step grid
    else:
        TB = B                            # single block == full array, no pad needed
    Bp = TB * n_steps
    if Bp != B:
        state = jnp.pad(state, ((0, Bp - B), (0, 0)))

    grid = (n_steps,)

    # Weight/bias blocks: constant index_map -> VMEM-resident across grid steps.
    const = lambda shape: pl.BlockSpec(shape, lambda i: (0, 0))

    flops = 2 * Bp * (S * H1 + H1 * H2 + H2 * LANE)
    bytes_accessed = (
        Bp * S * 4 + Bp * LANE * 2                 # x in (f32), q out (bf16)
        + (w1.size + w2.size + w3.size) * 2        # bf16 weights (once per call)
        + (b1.size + b2.size + b3.size) * 4)       # f32 biases

    out = pl.pallas_call(
        qnetwork_kernel,
        out_shape=jax.ShapeDtypeStruct((Bp, LANE), jnp.bfloat16),
        grid=grid,
        in_specs=[
            pl.BlockSpec((TB, S), lambda i: (i, 0)),
            const((S, H1)), const((1, H1)),
            const((H1, H2)), const((1, H2)),
            const((H2, LANE)), const((1, LANE)),
        ],
        out_specs=pl.BlockSpec((TB, LANE), lambda i: (i, 0)),
        compiler_params=pltpu.CompilerParams(
            dimension_semantics=("parallel",)),
        cost_estimate=pl.CostEstimate(
            flops=flops, transcendentals=0, bytes_accessed=bytes_accessed),
    )(state, w1, b1, w2, b2, w3, b3)

    return out[:B, :action_size]


def init_params(key, state_size, action_size, h1=H1, h2=H2):
    """Deterministic init mimicking nn.Linear default U(-1/sqrt(fan_in), +...).
    Weights stored (in, out) in bf16 (MXU-native); biases stay f32.
    The final layer is pre-padded to LANE output columns here (once), so the
    forward pass emits no per-call pad/cast ops."""
    ks = jax.random.split(key, 6)

    def linear(kw, kb, fan_in, fan_out):
        bound = 1.0 / jnp.sqrt(jnp.float32(fan_in))
        w = jax.random.uniform(kw, (fan_in, fan_out), jnp.float32, -bound, bound)
        b = jax.random.uniform(kb, (1, fan_out), jnp.float32, -bound, bound)
        return w, b

    w1, b1 = linear(ks[0], ks[1], state_size, h1)
    w2, b2 = linear(ks[2], ks[3], h1, h2)
    w3, b3 = linear(ks[4], ks[5], h2, action_size)

    # Lane-dense final layer: pad A -> LANE so the last MXU pass and the output
    # stores are unmasked; done once at init, sliced back in the wrapper.
    w3p = jnp.zeros((h2, LANE), jnp.float32).at[:, :action_size].set(w3)
    b3p = jnp.zeros((1, LANE), jnp.float32).at[:, :action_size].set(b3)

    return {
        "w1": w1.astype(jnp.bfloat16), "b1": b1,
        "w2": w2.astype(jnp.bfloat16), "b2": b2,
        "w3": w3p.astype(jnp.bfloat16), "b3": b3p,
    }


if __name__ == "__main__":
    # FlappyBird: observation_space has 12 features, action_space.n == 2.
    STATE_SIZE = 12
    ACTION_SIZE = 2
    BATCH = 256   # typical replay batch; multiple of 8 -> no batch padding

    key = jax.random.PRNGKey(0)
    k_param, k_state = jax.random.split(key)

    params = init_params(k_param, STATE_SIZE, ACTION_SIZE)
    state = jax.random.normal(k_state, (BATCH, STATE_SIZE), jnp.float32)

    fwd = jax.jit(qnetwork_forward, static_argnums=2)
    q_values = fwd(state, params, ACTION_SIZE)
    jax.block_until_ready(q_values)

    # Pure-JAX reference of the same math (bf16 weights/dot inputs, f32 accum).
    def ref(x, p):
        h = jnp.maximum(
            jnp.dot(x.astype(jnp.bfloat16), p["w1"],
                    preferred_element_type=jnp.float32) + p["b1"], 0.0)
        h = jnp.maximum(
            jnp.dot(h.astype(jnp.bfloat16), p["w2"],
                    preferred_element_type=jnp.float32) + p["b2"], 0.0)
        q = jnp.dot(h.astype(jnp.bfloat16), p["w3"],
                    preferred_element_type=jnp.float32) + p["b3"]
        return q[:, :ACTION_SIZE]

    expected = ref(state, params)
    got = q_values.astype(jnp.float32)
    assert q_values.shape == (BATCH, ACTION_SIZE)
    assert q_values.dtype == jnp.bfloat16
    assert jnp.allclose(got, expected, atol=2e-2, rtol=2e-2), (
        float(jnp.max(jnp.abs(got - expected))))

    print("KERNEL_OK")
</pallas_src>

<mosaic_0001>
module attributes {stable_mosaic.version = 11 : i64} {
  func.func @qnetwork_kernel(%arg0: i32, %arg1: memref<256x12xf32, #tpu.memory_space<vmem>>, %arg2: memref<12x512xbf16, #tpu.memory_space<vmem>>, %arg3: memref<1x512xf32, #tpu.memory_space<vmem>>, %arg4: memref<512x256xbf16, #tpu.memory_space<vmem>>, %arg5: memref<1x256xf32, #tpu.memory_space<vmem>>, %arg6: memref<256x128xbf16, #tpu.memory_space<vmem>>, %arg7: memref<1x128xf32, #tpu.memory_space<vmem>>, %arg8: memref<256x128xbf16, #tpu.memory_space<vmem>>) attributes {dimension_semantics = [#tpu.dimension_semantics<parallel>], iteration_bounds = array<i64: 1>, scalar_prefetch = 0 : i64, scratch_operands = 0 : i64, tpu.core_type = #tpu.core_type<tc>, window_params = [{transform_indices = @transform_0, window_bounds = array<i64: 256, 12>}, {pipeline_mode = #tpu.pipeline_mode<synchronous>, transform_indices = @transform_1, window_bounds = array<i64: 12, 512>}, {pipeline_mode = #tpu.pipeline_mode<synchronous>, transform_indices = @transform_2, window_bounds = array<i64: 1, 512>}, {pipeline_mode = #tpu.pipeline_mode<synchronous>, transform_indices = @transform_3, window_bounds = array<i64: 512, 256>}, {pipeline_mode = #tpu.pipeline_mode<synchronous>, transform_indices = @transform_4, window_bounds = array<i64: 1, 256>}, {pipeline_mode = #tpu.pipeline_mode<synchronous>, transform_indices = @transform_5, window_bounds = array<i64: 256, 128>}, {pipeline_mode = #tpu.pipeline_mode<synchronous>, transform_indices = @transform_6, window_bounds = array<i64: 1, 128>}, {transform_indices = @transform_7, window_bounds = array<i64: 256, 128>}]} {
    %c0 = arith.constant 0 : index
    %c0_0 = arith.constant 0 : index
    %0 = vector.load %arg1[%c0, %c0_0] : memref<256x12xf32, #tpu.memory_space<vmem>>, vector<256x12xf32>
    %1 = arith.truncf %0 : vector<256x12xf32> to vector<256x12xbf16>
    %c0_1 = arith.constant 0 : index
    %c0_2 = arith.constant 0 : index
    %2 = vector.load %arg2[%c0_1, %c0_2] : memref<12x512xbf16, #tpu.memory_space<vmem>>, vector<12x512xbf16>
    %cst = arith.constant dense<0.000000e+00> : vector<256x512xf32>
    %3 = tpu.matmul %1, %2, %cst {dimension_numbers = #tpu.dot_dimension_numbers<[1], [0], [0], [1], [0, 0, 1, 1], [], []>} : vector<256x12xbf16>, vector<12x512xbf16>, vector<256x512xf32> -> vector<256x512xf32>
    %c0_3 = arith.constant 0 : index
    %c0_4 = arith.constant 0 : index
    %4 = vector.load %arg3[%c0_3, %c0_4] : memref<1x512xf32, #tpu.memory_space<vmem>>, vector<1x512xf32>
    %5 = vector.broadcast %4 : vector<1x512xf32> to vector<256x512xf32>
    %6 = arith.addf %3, %5 : vector<256x512xf32>
    %cst_5 = arith.constant 0.000000e+00 : f32
    %7 = vector.broadcast %cst_5 : f32 to vector<256x512xf32>
    %8 = arith.maximumf %6, %7 : vector<256x512xf32>
    %9 = arith.truncf %8 : vector<256x512xf32> to vector<256x512xbf16>
    %c0_6 = arith.constant 0 : index
    %c0_7 = arith.constant 0 : index
    %10 = vector.load %arg4[%c0_6, %c0_7] : memref<512x256xbf16, #tpu.memory_space<vmem>>, vector<512x256xbf16>
    %cst_8 = arith.constant dense<0.000000e+00> : vector<256x256xf32>
    %11 = tpu.matmul %9, %10, %cst_8 {dimension_numbers = #tpu.dot_dimension_numbers<[1], [0], [0], [1], [0, 0, 1, 1], [], []>} : vector<256x512xbf16>, vector<512x256xbf16>, vector<256x256xf32> -> vector<256x256xf32>
    %c0_9 = arith.constant 0 : index
    %c0_10 = arith.constant 0 : index
    %12 = vector.load %arg5[%c0_9, %c0_10] : memref<1x256xf32, #tpu.memory_space<vmem>>, vector<1x256xf32>
    %13 = vector.broadcast %12 : vector<1x256xf32> to vector<256x256xf32>
    %14 = arith.addf %11, %13 : vector<256x256xf32>
    %cst_11 = arith.constant 0.000000e+00 : f32
    %15 = vector.broadcast %cst_11 : f32 to vector<256x256xf32>
    %16 = arith.maximumf %14, %15 : vector<256x256xf32>
    %17 = arith.truncf %16 : vector<256x256xf32> to vector<256x256xbf16>
    %c0_12 = arith.constant 0 : index
    %c0_13 = arith.constant 0 : index
    %18 = vector.load %arg6[%c0_12, %c0_13] : memref<256x128xbf16, #tpu.memory_space<vmem>>, vector<256x128xbf16>
    %cst_14 = arith.constant dense<0.000000e+00> : vector<256x128xf32>
    %19 = tpu.matmul %17, %18, %cst_14 {dimension_numbers = #tpu.dot_dimension_numbers<[1], [0], [0], [1], [0, 0, 1, 1], [], []>} : vector<256x256xbf16>, vector<256x128xbf16>, vector<256x128xf32> -> vector<256x128xf32>
    %c0_15 = arith.constant 0 : index
    %c0_16 = arith.constant 0 : index
    %20 = vector.load %arg7[%c0_15, %c0_16] : memref<1x128xf32, #tpu.memory_space<vmem>>, vector<1x128xf32>
    %21 = vector.broadcast %20 : vector<1x128xf32> to vector<256x128xf32>
    %22 = arith.addf %19, %21 : vector<256x128xf32>
    %23 = arith.truncf %22 : vector<256x128xf32> to vector<256x128xbf16>
    %c0_17 = arith.constant 0 : index
    %c0_18 = arith.constant 0 : index
    %24 = vector.load %arg8[%c0_17, %c0_18] : memref<256x128xbf16, #tpu.memory_space<vmem>>, vector<256x128xbf16>
    tpu.vector_store %arg8[%c0_17, %c0_18], %23 {strides = array<i32>} : memref<256x128xbf16, #tpu.memory_space<vmem>>, vector<256x128xbf16>,
    return
  }
  func.func @transform_0(%arg0: i32) -> (i32, i32) {
    %c0_i32 = arith.constant 0 : i32
    %c0_i32_0 = arith.constant 0 : i32
    return %arg0, %c0_i32 : i32, i32
  }
  func.func @transform_1(%arg0: i32) -> (i32, i32) {
    %c0_i32 = arith.constant 0 : i32
    %c0_i32_0 = arith.constant 0 : i32
    %c0_i32_1 = arith.constant 0 : i32
    return %c0_i32, %c0_i32_0 : i32, i32
  }
  func.func @transform_2(%arg0: i32) -> (i32, i32) {
    %c0_i32 = arith.constant 0 : i32
    %c0_i32_0 = arith.constant 0 : i32
    %c0_i32_1 = arith.constant 0 : i32
    return %c0_i32, %c0_i32_0 : i32, i32
  }
  func.func @transform_3(%arg0: i32) -> (i32, i32) {
    %c0_i32 = arith.constant 0 : i32
    %c0_i32_0 = arith.constant 0 : i32
    %c0_i32_1 = arith.constant 0 : i32
    return %c0_i32, %c0_i32_0 : i32, i32
  }
  func.func @transform_4(%arg0: i32) -> (i32, i32) {
    %c0_i32 = arith.constant 0 : i32
    %c0_i32_0 = arith.constant 0 : i32
    %c0_i32_1 = arith.constant 0 : i32
    return %c0_i32, %c0_i32_0 : i32, i32
  }
  func.func @transform_5(%arg0: i32) -> (i32, i32) {
    %c0_i32 = arith.constant 0 : i32
    %c0_i32_0 = arith.constant 0 : i32
    %c0_i32_1 = arith.constant 0 : i32
    return %c0_i32, %c0_i32_0 : i32, i32
  }
  func.func @transform_6(%arg0: i32) -> (i32, i32) {
    %c0_i32 = arith.constant 0 : i32
    %c0_i32_0 = arith.constant 0 : i32
    %c0_i32_1 = arith.constant 0 : i32
    return %c0_i32, %c0_i32_0 : i32, i32
  }
  func.func @transform_7(%arg0: i32) -> (i32, i32) {
    %c0_i32 = arith.constant 0 : i32
    %c0_i32_0 = arith.constant 0 : i32
    return %arg0, %c0_i32 : i32, i32
  }
}

</mosaic_0001>

<bundles_post_ra>
// kernel: qnetwork_forward.1
= control target key start
LH: loop header
LB: loop body
LE: loop exit
PB: predicated region body
PF: predicated region fallthrough
CT: control target
= control target key end

     0   :  { %12 = vsyncpa [#allocation3], 0  ;;  %s2776_s24 = smov [#allocation2]   ;;  %s3544_s0 = inlined_call_operand.vmem [shape: f32[256,12], index: 0, kind: input, shape index: {}]   ;;  %s3545_s1 = inlined_call_operand.vmem [shape: bf16[12,512], index: 1, kind: input, shape index: {}]   ;;  %s3546_s2 = inlined_call_operand.vmem [shape: f32[1,512], index: 2, kind: input, shape index: {}]   ;;  %s3547_s3 = inlined_call_operand.hbm [shape: bf16[512,256], index: 3, kind: input, shape index: {}]   ;;  %s3548_s4 = inlined_call_operand.vmem [shape: f32[1,256], index: 4, kind: input, shape index: {}]   ;;  %s3549_s5 = inlined_call_operand.vmem [shape: bf16[256,128], index: 5, kind: input, shape index: {}]   ;;  %s3550_s6 = inlined_call_operand.vmem [shape: f32[1,128], index: 6, kind: input, shape index: {}]   ;;  %s3551_s7 = inlined_call_operand.vmem [shape: bf16[256,128], index: 7, kind: output, shape index: {}]  }
   0x1   :  { %s24_s25 = sshll.u32 %s2776_s24, 4  ;;  %s2752_s28 = scalar_lea.hbm %s3547_s3, 8192  ;;  %s25_s25 = int_to_ptr.vmem [resolvable:$true] %s24_s25 }
   0x2   :  { %p2753_p0 = scmp.ne.s32.totalorder %s3547_s3, %s2752_s28  ;;  %p2756_p1 = scmp.lt.u32.totalorder %s2752_s28, %s3547_s3 }
   0x4   :  { %p2758_p2 = pnand %p2756_p1, %p2753_p0 }
   0x6   :  { %2761 = shalt.err (!%p2758_p2)
}
   0x7   :  { %s2762_s10 = scalar_lea.vmem %s25_s25, 8192  ;;  %p2767_p4 = scmp.lt.s32.totalorder %s25_s25, %s25_s25 }
   0x8   :  { %p2763_p3 = scmp.ne.s32.totalorder %s25_s25, %s2762_s10  ;;  %p2768_p5 = scmp.lt.s32.totalorder %s2762_s10, %s2762_s10 }
   0xa   :  { %p2769_p6 = por %p2768_p5, %p2767_p4 }
   0xc   :  { %p2770_p7 = pnand %p2769_p6, %p2763_p3 }
   0xe   :  { %2773 = shalt.err (!%p2770_p7)
}
   0xf   :  { %s2777_s11 = smov 128   ;;  %s2778_s12 = smov 8  }
  0x10   :  { %30 = dma.hbm_to_vmem [thread:$0]  %s3547_s3, 8192, %s25_s25, [#allocation3], %s2777_s11, %s2777_s11, %s2778_s12  }
  0x11   :  { %2774 = dma.done.wait [#allocation3], 8192  }
  0x12   :  { %2775 = vsyncadd [#allocation3], 4294959104  ;;  %v2779_v0 = vmov 0   ;;  %vm180_vm0 = vcmask 1045504   ;;  %v41_v3 = vld [vmem:[%s3544_s0] sm:$0xff]  ;;  %v42_v4 = vld [vmem:[%s3544_s0 + $0x8] sm:$0xff] }
  0x13   :  { %225 = vmatprep.mubr.bf16.mxu0 %v2779_v0  ;;  %305 = vmatprep.mubr.bf16.mxu1 %v2779_v0  ;;  %v2634_v1 = vld [vmem:[%s3545_s1 + $0x4] ss:$16 sps:$4 sm:$0x3f]   ;;  %v2636_v2 = vld [vmem:[%s3545_s1] ss:$16 sps:$4 sm:$0x3f]   ;;  %v2849_v6 = vpack.c.bf16 %v42_v4, %v41_v3 }
  0x14   :  { %2114 = vmatprep.subr.msk.bf16.mxu0 %vm180_vm0, %v2634_v1  ;;  %2500 = vmatprep.subr.msk.bf16.mxu1 %vm180_vm0, %v2634_v1  ;;  %v182_v5 = vsel %vm180_vm0, %v2636_v2, 0  ;;  %vm131_vm1 = vcmask 97280   ;;  %v43_v7 = vld [vmem:[%s3544_s0 + $0x10] sm:$0xff]  ;;  %v44_v8 = vld [vmem:[%s3544_s0 + $0x18] sm:$0xff]  ;;  %v57_v9 = vld [vmem:[%s3544_s0 + $0x80] sm:$0xff] }
  0x15   :  { %194 = vmatpush1.bf16.msra.mxu0 %v182_v5  ;;  %2501 = vmatpush1.bf16.msra.mxu1 %v182_v5  ;;  %v58_v10 = vld [vmem:[%s3544_s0 + $0x88] sm:$0xff]  ;;  %v2878_v15 = vpack.c.bf16 %v44_v8, %v43_v7  ;;  %v59_v16 = vld [vmem:[%s3544_s0 + $0x90] sm:$0xff]  ;;  %v60_v17 = vld [vmem:[%s3544_s0 + $0x98] sm:$0xff] }
  0x16   :  { %v2866_v11 = vpack.c.bf16 %v58_v10, %v57_v9  ;;  %v2637_v12 = vld [vmem:[%s3545_s1 + $0xc] ss:$16 sps:$4 sm:$0x3f]   ;;  %v2639_v13 = vld [vmem:[%s3545_s1 + $0x8] ss:$16 sps:$4 sm:$0x3f]   ;;  %v2890_v19 = vpack.c.bf16 %v60_v17, %v59_v16 }
  0x17   :  { %2131 = vmatprep.subr.msk.bf16.mxu1 %vm180_vm0, %v2637_v12  ;;  %v188_v14 = vsel %vm180_vm0, %v2639_v13, 0  ;;  %v45_v18 = vld [vmem:[%s3544_s0 + $0x20] sm:$0xff]  ;;  %v46_v22 = vld [vmem:[%s3544_s0 + $0x28] sm:$0xff]  ;;  %v2645_v23 = vld [vmem:[#allocation2 + $0x14] ss:$8 sps:$4 sm:$0xff]  }
  0x18   :  { %2115 = vmatmul.mubr.msk.bf16.vlgmr.msra.gmra.mrb[0].mxu0 %vm131_vm1, %v2849_v6  ;;  %2123 = vmatmul.mubr.msk.bf16.vlgmr.msra.gmra.mrb[0].mxu1 %vm131_vm1, %v2866_v11  ;;  %v2640_v20 = vld [vmem:[#allocation2] ss:$8 sps:$4 sm:$0xff]   ;;  %v2642_v21 = vld [vmem:[#allocation2 + $0x4] ss:$8 sps:$4 sm:$0xff]   ;;  %v2643_v24 = vld [vmem:[#allocation2 + $0x10] ss:$8 sps:$4 sm:$0xff]   ;;  %v2903_v27 = vpack.c.bf16 %v46_v22, %v45_v18 }
  0x19   :  { %235 = vmatprep.mubr.bf16.mxu0 %v2779_v0  ;;  %387 = vmatpush1.bf16.msra.mxu1 %v188_v14  ;;  %v61_v25 = vld [vmem:[%s3544_s0 + $0xa0] sm:$0xff]  ;;  %v62_v28 = vld [vmem:[%s3544_s0 + $0xa8] sm:$0xff]  ;;  %v2651_v31 = vld [vmem:[#allocation2 + $0x34] ss:$8 sps:$4 sm:$0xff]  }
  0x1a   :  { %315 = vmatprep.mubr.bf16.mxu1 %v2779_v0  ;;  %1167 = vmatprep.subr.bf16.mxu0 %v2642_v21  ;;  %v2648_v26 = vld [vmem:[#allocation2 + $0x24] ss:$8 sps:$4 sm:$0xff]   ;;  %v2646_v29 = vld [vmem:[#allocation2 + $0x20] ss:$8 sps:$4 sm:$0xff]   ;;  %v2909_v30 = vpack.c.bf16 %v62_v28, %v61_v25  ;;  %v47_v32 = vld [vmem:[%s3544_s0 + $0x30] sm:$0xff] }
  0x1b   :  { %1168 = vmatpush1.bf16.msra.mxu0 %v2640_v20  ;;  %v48_v33 = vld [vmem:[%s3544_s0 + $0x38] sm:$0xff]  ;;  %v63_v35 = vld [vmem:[%s3544_s0 + $0xb0] sm:$0xff]  ;;  %v2654_v36 = vld [vmem:[#allocation2 + $0x44] ss:$8 sps:$4 sm:$0xff]  }
  0x1c   :  { %1169 = vmatprep.subr.bf16.mxu0 %v2645_v23  ;;  %v2649_v34 = vld [vmem:[#allocation2 + $0x30] ss:$8 sps:$4 sm:$0xff]   ;;  %v2925_v37 = vpack.c.bf16 %v48_v33, %v47_v32  ;;  %v2652_v39 = vld [vmem:[#allocation2 + $0x40] ss:$8 sps:$4 sm:$0xff]   ;;  %v2657_v42 = vld [vmem:[#allocation2 + $0x54] ss:$8 sps:$4 sm:$0xff]  }
  0x1d   :  { %v64_v38 = vld [vmem:[%s3544_s0 + $0xb8] sm:$0xff]  ;;  %v49_v40 = vld [vmem:[%s3544_s0 + $0x40] sm:$0xff]  ;;  %v50_v43 = vld [vmem:[%s3544_s0 + $0x48] sm:$0xff] }
  0x1e   :  { %v2934_v41 = vpack.c.bf16 %v64_v38, %v63_v35  ;;  %v2655_v44 = vld [vmem:[#allocation2 + $0x50] ss:$8 sps:$4 sm:$0xff]   ;;  %v2660_v45 = vld [vmem:[#allocation2 + $0x64] ss:$8 sps:$4 sm:$0xff]   ;;  %v2950_v48 = vpack.c.bf16 %v50_v43, %v49_v40  ;;  %v2658_v49 = vld [vmem:[#allocation2 + $0x60] ss:$8 sps:$4 sm:$0xff]  }
  0x1f   :  { %1170 = vmatpush1.bf16.msra.mxu0 %v2643_v24  ;;  %v65_v46 = vld [vmem:[%s3544_s0 + $0xc0] sm:$0xff]  ;;  %v66_v47 = vld [vmem:[%s3544_s0 + $0xc8] sm:$0xff]  ;;  %v2663_v50 = vld [vmem:[#allocation2 + $0x74] ss:$8 sps:$4 sm:$0xff]  }
  0x20   :  { %2116 = vmatmul.mubr.msk.bf16.gmra.mrb[4].mxu0 %vm131_vm1, %v2878_v15  ;;  %2124 = vmatmul.mubr.msk.bf16.gmra.mrb[4].mxu1 %vm131_vm1, %v2890_v19  ;;  %v51_v51 = vld [vmem:[%s3544_s0 + $0x50] sm:$0xff]  ;;  %v52_v52 = vld [vmem:[%s3544_s0 + $0x58] sm:$0xff]  ;;  %v2959_v53 = vpack.c.bf16 %v66_v47, %v65_v46  ;;  %v2666_v55 = vld [vmem:[#allocation2 + $0x84] ss:$8 sps:$4 sm:$0xff]  }
  0x21   :  { %245 = vmatprep.mubr.bf16.mxu0 %v2779_v0  ;;  %325 = vmatprep.mubr.bf16.mxu1 %v2779_v0  ;;  %v2661_v54 = vld [vmem:[#allocation2 + $0x70] ss:$8 sps:$4 sm:$0xff]   ;;  %v2972_v58 = vpack.c.bf16 %v52_v52, %v51_v51  ;;  %v2664_v59 = vld [vmem:[#allocation2 + $0x80] ss:$8 sps:$4 sm:$0xff]   ;;  %v2669_v60 = vld [vmem:[#allocation2 + $0x94] ss:$8 sps:$4 sm:$0xff]  }
  0x22   :  { %1171 = vmatprep.subr.bf16.mxu0 %v2648_v26  ;;  %v67_v56 = vld [vmem:[%s3544_s0 + $0xd0] sm:$0xff]  ;;  %v68_v57 = vld [vmem:[%s3544_s0 + $0xd8] sm:$0xff]  ;;  %v53_v61 = vld [vmem:[%s3544_s0 + $0x60] sm:$0xff] }
  0x23   :  { %1172 = vmatpush1.bf16.msra.mxu0 %v2646_v29  ;;  %v54_v62 = vld [vmem:[%s3544_s0 + $0x68] sm:$0xff]  ;;  %v2981_v63 = vpack.c.bf16 %v68_v57, %v67_v56  ;;  %v2667_v1 = vld [vmem:[#allocation2 + $0x90] ss:$8 sps:$4 sm:$0xff]   ;;  %v69_v3 = vld [vmem:[%s3544_s0 + $0xe0] sm:$0xff] }
  0x24   :  { %1173 = vmatprep.subr.bf16.mxu0 %v2651_v31  ;;  %v2672_v2 = vld [vmem:[#allocation2 + $0xa4] ss:$8 sps:$4 sm:$0xff]   ;;  %v79_v5 = vpack.c.bf16 %v54_v62, %v53_v61  ;;  %v2670_v7 = vld [vmem:[#allocation2 + $0xa0] ss:$8 sps:$4 sm:$0xff]   ;;  %v2675_v8 = vld [vmem:[#allocation2 + $0xb4] ss:$8 sps:$4 sm:$0xff]  }
  0x25   :  { %v70_v4 = vld [vmem:[%s3544_s0 + $0xe8] sm:$0xff]  ;;  %v55_v10 = vld [vmem:[%s3544_s0 + $0x70] sm:$0xff]  ;;  %v56_v12 = vld [vmem:[%s3544_s0 + $0x78] sm:$0xff] }
  0x26   :  { %v2995_v9 = vpack.c.bf16 %v70_v4, %v69_v3  ;;  %v2673_v13 = vld [vmem:[#allocation2 + $0xb0] ss:$8 sps:$4 sm:$0xff]   ;;  %v2678_v14 = vld [vmem:[#allocation2 + $0xc4] ss:$8 sps:$4 sm:$0xff]   ;;  %v80_v16 = vpack.c.bf16 %v56_v12, %v55_v10  ;;  %v2676_v20 = vld [vmem:[#allocation2 + $0xc0] ss:$8 sps:$4 sm:$0xff]  }
  0x27   :  { %1174 = vmatpush1.bf16.msra.mxu0 %v2649_v34  ;;  %v71_v17 = vld [vmem:[%s3544_s0 + $0xf0] sm:$0xff]  ;;  %v72_v18 = vld [vmem:[%s3544_s0 + $0xf8] sm:$0xff]  ;;  %v2684_v24 = vld [vmem:[#allocation2 + $0xe4] ss:$8 sps:$4 sm:$0xff]  }
  0x28   :  { %2117 = vmatmul.mubr.msk.bf16.gmra.mrb[8].mxu0 %vm131_vm1, %v2903_v27  ;;  %2125 = vmatmul.mubr.msk.bf16.gmra.mrb[8].mxu1 %vm131_vm1, %v2909_v30  ;;  %v88_v21 = vpack.c.bf16 %v72_v18, %v71_v17  ;;  %v2681_v22 = vld [vmem:[#allocation2 + $0xd4] ss:$8 sps:$4 sm:$0xff]   ;;  %v2679_v23 = vld [vmem:[#allocation2 + $0xd0] ss:$8 sps:$4 sm:$0xff]   ;;  %v2682_v25 = vld [vmem:[#allocation2 + $0xe0] ss:$8 sps:$4 sm:$0xff]  }
  0x29   :  { %255 = vmatprep.mubr.bf16.mxu0 %v2779_v0  ;;  %335 = vmatprep.mubr.bf16.mxu1 %v2779_v0  ;;  %v2687_v26 = vld [vmem:[#allocation2 + $0xf4] ss:$8 sps:$4 sm:$0xff]   ;;  %v2685_v28 = vld [vmem:[#allocation2 + $0xf0] ss:$8 sps:$4 sm:$0xff]   ;;  %v2688_v56 = vld [vmem:[#allocation2 + $0x100] ss:$8 sps:$4 sm:$0xff]  }
  0x2a   :  { %1175 = vmatprep.subr.bf16.mxu0 %v2654_v36 }
  0x2b   :  { %1176 = vmatpush1.bf16.msra.mxu0 %v2652_v39 }
  0x2c   :  { %1177 = vmatprep.subr.bf16.mxu0 %v2657_v42 }
  0x2f   :  { %1178 = vmatpush1.bf16.msra.mxu0 %v2655_v44 }
  0x30   :  { %2118 = vmatmul.mubr.msk.bf16.gmra.mrb[12].mxu0 %vm131_vm1, %v2925_v37  ;;  %2126 = vmatmul.mubr.msk.bf16.gmra.mrb[12].mxu1 %vm131_vm1, %v2934_v41 }
  0x31   :  { %265 = vmatprep.mubr.bf16.mxu0 %v2779_v0  ;;  %345 = vmatprep.mubr.bf16.mxu1 %v2779_v0 }
  0x32   :  { %1179 = vmatprep.subr.bf16.mxu0 %v2660_v45 }
  0x33   :  { %1180 = vmatpush1.bf16.msra.mxu0 %v2658_v49 }
  0x34   :  { %1181 = vmatprep.subr.bf16.mxu0 %v2663_v50 }
  0x37   :  { %1182 = vmatpush1.bf16.msra.mxu0 %v2661_v54 }
  0x38   :  { %2119 = vmatmul.mubr.msk.bf16.gmra.mrb[16].mxu0 %vm131_vm1, %v2950_v48  ;;  %2127 = vmatmul.mubr.msk.bf16.gmra.mrb[16].mxu1 %vm131_vm1, %v2959_v53 }
  0x39   :  { %275 = vmatprep.mubr.bf16.mxu0 %v2779_v0  ;;  %355 = vmatprep.mubr.bf16.mxu1 %v2779_v0 }
  0x3a   :  { %1183 = vmatprep.subr.bf16.mxu0 %v2666_v55 }
  0x3b   :  { %1184 = vmatpush1.bf16.msra.mxu0 %v2664_v59 }
  0x3c   :  { %1185 = vmatprep.subr.bf16.mxu0 %v2669_v60  ;;  %v2693_v60 = vld [vmem:[#allocation2 + $0x114] ss:$8 sps:$4 sm:$0xff]  }
  0x3f   :  { %1186 = vmatpush1.bf16.msra.mxu0 %v2667_v1 }
  0x40   :  { %2120 = vmatmul.mubr.msk.bf16.gmra.mrb[20].mxu0 %vm131_vm1, %v2972_v58  ;;  %2128 = vmatmul.mubr.msk.bf16.gmra.mrb[20].mxu1 %vm131_vm1, %v2981_v63 }
  0x41   :  { %285 = vmatprep.mubr.bf16.mxu0 %v2779_v0  ;;  %365 = vmatprep.mubr.bf16.mxu1 %v2779_v0 }
  0x42   :  { %1187 = vmatprep.subr.bf16.mxu0 %v2672_v2 }
  0x43   :  { %1188 = vmatpush1.bf16.msra.mxu0 %v2670_v7 }
  0x44   :  { %1189 = vmatprep.subr.bf16.mxu0 %v2675_v8  ;;  %v2691_v8 = vld [vmem:[#allocation2 + $0x110] ss:$8 sps:$4 sm:$0xff]  }
  0x47   :  { %1190 = vmatpush1.bf16.msra.mxu0 %v2673_v13 }
  0x48   :  { %2121 = vmatmul.mubr.msk.bf16.gmra.mrb[24].mxu0 %vm131_vm1, %v79_v5  ;;  %2129 = vmatmul.mubr.msk.bf16.gmra.mrb[24].mxu1 %vm131_vm1, %v2995_v9 }
  0x49   :  { %295 = vmatprep.mubr.bf16.mxu0 %v2779_v0  ;;  %375 = vmatprep.mubr.bf16.mxu1 %v2779_v0 }
  0x4a   :  { %1191 = vmatprep.subr.bf16.mxu0 %v2678_v14  ;;  %v2696_v14 = vld [vmem:[#allocation2 + $0x124] ss:$8 sps:$4 sm:$0xff]  }
  0x4b   :  { %1192 = vmatpush1.bf16.msra.mxu0 %v2676_v20 }
  0x4c   :  { %1193 = vmatprep.subr.bf16.mxu0 %v2681_v22 }
  0x4f   :  { %1194 = vmatpush1.bf16.msra.mxu0 %v2679_v23 }
  0x50   :  { %2122 = vmatmul.mubr.msk.bf16.gmra.mrb[28].mxu0 %vm131_vm1, %v80_v16  ;;  %2130 = vmatmul.mubr.msk.bf16.gmra.mrb[28].mxu1 %vm131_vm1, %v88_v21 }
  0x51   :  { %418 = vmatprep.mubr.bf16.mxu1 %v2779_v0  ;;  %1195 = vmatprep.subr.bf16.mxu0 %v2684_v24 }
  0x53   :  { %1196 = vmatpush1.bf16.msra.mxu0 %v2682_v25 }
  0x54   :  { %1197 = vmatprep.subr.bf16.mxu0 %v2687_v26 }
  0x57   :  { %1198 = vmatpush1.bf16.msra.mxu0 %v2685_v28 }
  0x58   :  { %2132 = vmatmul.mubr.msk.bf16.vlgmr.msra.gmra.mrb[32].mxu1 %vm131_vm1, %v2849_v6  ;;  %v2690_v6 = vld [vmem:[#allocation2 + $0x104] ss:$8 sps:$4 sm:$0xff]  }
  0x59   :  { %428 = vmatprep.mubr.bf16.mxu1 %v2779_v0  ;;  %1360 = vmatprep.subr.bf16.mxu0 %v2690_v6 }
  0x60   :  { %2133 = vmatmul.mubr.msk.bf16.gmra.mrb[36].mxu1 %vm131_vm1, %v2878_v15 }
  0x61   :  { %438 = vmatprep.mubr.bf16.mxu1 %v2779_v0 }
  0x68   :  { %2134 = vmatmul.mubr.msk.bf16.gmra.mrb[40].mxu1 %vm131_vm1, %v2903_v27  ;;  %v3067_v27 = vld [vmem:[%s3546_s2] sm:$0xf] }
  0x69   :  { %448 = vmatprep.mubr.bf16.mxu1 %v2779_v0 }
  0x70   :  { %2135 = vmatmul.mubr.msk.bf16.gmra.mrb[44].mxu1 %vm131_vm1, %v2925_v37 }
  0x71   :  { %458 = vmatprep.mubr.bf16.mxu1 %v2779_v0 }
  0x78   :  { %2136 = vmatmul.mubr.msk.bf16.gmra.mrb[48].mxu1 %vm131_vm1, %v2950_v48 }
  0x79   :  { %468 = vmatprep.mubr.bf16.mxu1 %v2779_v0 }
  0x80   :  { %2137 = vmatmul.mubr.msk.bf16.gmra.mrb[52].mxu1 %vm131_vm1, %v2972_v58 }
  0x81   :  { %478 = vmatprep.mubr.bf16.mxu1 %v2779_v0 }
  0x88   :  { %2138 = vmatmul.mubr.msk.bf16.gmra.mrb[56].mxu1 %vm131_vm1, %v79_v5 }
  0x89   :  { %488 = vmatprep.mubr.bf16.mxu1 %v2779_v0 }
  0x90   :  { %2139 = vmatmul.mubr.msk.bf16.gmra.mrb[60].mxu1 %vm131_vm1, %v80_v16 }
  0x91   :  { %498 = vmatprep.mubr.bf16.mxu1 %v2779_v0 }
  0x98   :  { %2140 = vmatmul.mubr.msk.bf16.gmra.mrb[64].mxu1 %vm131_vm1, %v2866_v11  ;;  %v95_v11 = vlaneseq }
  0x99   :  { %508 = vmatprep.mubr.bf16.mxu1 %v2779_v0 }
  0x9a   :  { %v3061_v15 = vshrl.u32 %v95_v11, 7  ;;  %v2694_v11 = vld [vmem:[#allocation2 + $0x120] ss:$8 sps:$4 sm:$0xff]  }
  0x9c   :  { %v101_v29 = vsub.s32 1, %v3061_v15 }
  0xa0   :  { %2141 = vmatmul.mubr.msk.bf16.gmra.mrb[68].mxu1 %vm131_vm1, %v2890_v19  ;;  %v97_v19 = vsub.s32 0, %v3061_v15 }
  0xa1   :  { %518 = vmatprep.mubr.bf16.mxu1 %v2779_v0 }
  0xa8   :  { %2142 = vmatmul.mubr.msk.bf16.gmra.mrb[72].mxu1 %vm131_vm1, %v2909_v30  ;;  %v3073_v30 = vrot.slane %v3067_v27, %v97_v19 }
  0xa9   :  { %528 = vmatprep.mubr.bf16.mxu1 %v2779_v0 }
  0xb0   :  { %2143 = vmatmul.mubr.msk.bf16.gmra.mrb[76].mxu1 %vm131_vm1, %v2934_v41 }
  0xb1   :  { %538 = vmatprep.mubr.bf16.mxu1 %v2779_v0 }
  0xb8   :  { %2144 = vmatmul.mubr.msk.bf16.gmra.mrb[80].mxu1 %vm131_vm1, %v2959_v53 }
  0xb9   :  { %548 = vmatprep.mubr.bf16.mxu1 %v2779_v0 }
  0xc0   :  { %2145 = vmatmul.mubr.msk.bf16.gmra.mrb[84].mxu1 %vm131_vm1, %v2981_v63 }
  0xc1   :  { %558 = vmatprep.mubr.bf16.mxu1 %v2779_v0 }
  0xc8   :  { %2146 = vmatmul.mubr.msk.bf16.gmra.mrb[88].mxu1 %vm131_vm1, %v2995_v9 }
  0xc9   :  { %568 = vmatprep.mubr.bf16.mxu1 %v2779_v0  ;;  %v3078_v0 = vrot.slane %v3067_v27, %v101_v29 }
  0xd0   :  { %2147 = vmatmul.mubr.msk.bf16.gmra.mrb[92].mxu1 %vm131_vm1, %v88_v21 }
  0xeb   :  { %v227_v31 = vpop.f32.mrb[0].mxu0  ;;  %v307_v38 = vpop.f32.mrb[0].mxu1 }
  0xec   :  { %v228_v32 = vadd.f32 %v227_v31, %v3073_v30  ;;  %v229_v33 = vpop.f32.mrb[1].mxu0  ;;  %v308_v40 = vadd.f32 %v307_v38, %v3073_v30  ;;  %v309_v41 = vpop.f32.mrb[1].mxu1 }
  0xed   :  { %v230_v34 = vadd.f32 %v229_v33, %v3078_v0  ;;  %v231_v35 = vpop.f32.mrb[2].mxu0  ;;  %v310_v44 = vadd.f32 %v309_v41, %v3078_v0  ;;  %v311_v45 = vpop.f32.mrb[2].mxu1 }
  0xee   :  { %v232_v36 = vadd.f32 %v231_v35, %v3073_v30  ;;  %v233_v37 = vpop.f32.mrb[3].mxu0  ;;  %v579_v42 = vmax.f32 %v228_v32, 0.0  ;;  %v643_v48 = vmax.f32 %v308_v40, 0.0  ;;  %v312_v49 = vadd.f32 %v311_v45, %v3073_v30  ;;  %v313_v50 = vpop.f32.mrb[3].mxu1 }
  0xef   :  { %v234_v39 = vadd.f32 %v233_v37, %v3078_v0  ;;  %v580_v46 = vmax.f32 %v230_v34, 0.0  ;;  %v644_v52 = vmax.f32 %v310_v44, 0.0  ;;  %v314_v53 = vadd.f32 %v313_v50, %v3078_v0  ;;  %v2699_v34 = vld [vmem:[#allocation2 + $0x134] ss:$8 sps:$4 sm:$0xff]   ;;  %v2697_v44 = vld [vmem:[#allocation2 + $0x130] ss:$8 sps:$4 sm:$0xff]  }
  0xf0   :  { %v583_v43 = vmax.f32 %v232_v36, 0.0  ;;  %v647_v57 = vmax.f32 %v312_v49, 0.0  ;;  %v2702_v49 = vld [vmem:[#allocation2 + $0x144] ss:$8 sps:$4 sm:$0xff]  }
  0xf1   :  { %v584_v47 = vmax.f32 %v234_v39, 0.0  ;;  %v648_v61 = vmax.f32 %v314_v53, 0.0 }
  0xf2   :  { %v707_v51 = vpack.c.bf16 %v583_v43, %v579_v42  ;;  %v3090_v1 = vpack.c.bf16 %v647_v57, %v643_v48 }
  0xf3   :  { %v708_v54 = vpack.c.bf16 %v584_v47, %v580_v46  ;;  %v237_v55 = vpop.f32.mrb[4].mxu0  ;;  %v3093_v4 = vpack.c.bf16 %v648_v61, %v644_v52  ;;  %v317_v5 = vpop.f32.mrb[4].mxu1 }
  0xf4   :  { %v238_v58 = vadd.f32 %v237_v55, %v3073_v30  ;;  %v239_v59 = vpop.f32.mrb[5].mxu0  ;;  %v318_v9 = vadd.f32 %v317_v5, %v3073_v30  ;;  %v319_v10 = vpop.f32.mrb[5].mxu1  ;;  %v2705_v5 = vld [vmem:[#allocation2 + $0x154] ss:$8 sps:$4 sm:$0xff]  }
  0xf5   :  { %v240_v62 = vadd.f32 %v239_v59, %v3078_v0  ;;  %v241_v63 = vpop.f32.mrb[6].mxu0  ;;  %1199 = vmatprep.mubr.bf16.mxu0 %v708_v54  ;;  %v320_v16 = vadd.f32 %v319_v10, %v3078_v0  ;;  %v321_v17 = vpop.f32.mrb[6].mxu1 }
  0xf6   :  { %v242_v2 = vadd.f32 %v241_v63, %v3073_v30  ;;  %v243_v3 = vpop.f32.mrb[7].mxu0  ;;  %1200 = vmatmul.mubr.bf16.vlgmr.msra.gmra.mrb[32].mxu0 %v707_v51  ;;  %v587_v12 = vmax.f32 %v238_v58, 0.0  ;;  %v651_v21 = vmax.f32 %v318_v9, 0.0  ;;  %v322_v22 = vadd.f32 %v321_v17, %v3073_v30  ;;  %v323_v23 = vpop.f32.mrb[7].mxu1 }
  0xf7   :  { %v244_v7 = vadd.f32 %v243_v3, %v3078_v0  ;;  %1361 = vmatpush1.bf16.msra.mxu0 %v2688_v56  ;;  %v588_v18 = vmax.f32 %v240_v62, 0.0  ;;  %v652_v25 = vmax.f32 %v320_v16, 0.0  ;;  %v324_v26 = vadd.f32 %v323_v23, %v3078_v0  ;;  %v2700_v62 = vld [vmem:[#allocation2 + $0x140] ss:$8 sps:$4 sm:$0xff]  }
  0xf8   :  { %v591_v13 = vmax.f32 %v242_v2, 0.0  ;;  %1362 = vmatprep.subr.bf16.mxu0 %v2693_v60  ;;  %v655_v31 = vmax.f32 %v322_v22, 0.0 }
  0xf9   :  { %v592_v20 = vmax.f32 %v244_v7, 0.0  ;;  %v656_v35 = vmax.f32 %v324_v26, 0.0 }
  0xfa   :  { %v711_v24 = vpack.c.bf16 %v591_v13, %v587_v12  ;;  %v3102_v38 = vpack.c.bf16 %v655_v31, %v651_v21 }
  0xfb   :  { %v712_v28 = vpack.c.bf16 %v592_v20, %v588_v18  ;;  %v247_v6 = vpop.f32.mrb[8].mxu0  ;;  %1363 = vmatpush1.bf16.msra.mxu0 %v2691_v8  ;;  %v3105_v41 = vpack.c.bf16 %v656_v35, %v652_v25  ;;  %v327_v42 = vpop.f32.mrb[8].mxu1  ;;  %v2703_v18 = vld [vmem:[#allocation2 + $0x150] ss:$8 sps:$4 sm:$0xff]  }
  0xfc   :  { %v248_v32 = vadd.f32 %v247_v6, %v3073_v30  ;;  %v249_v33 = vpop.f32.mrb[9].mxu0  ;;  %1364 = vmatprep.subr.bf16.mxu0 %v2696_v14  ;;  %v328_v45 = vadd.f32 %v327_v42, %v3073_v30  ;;  %v329_v46 = vpop.f32.mrb[9].mxu1 }
  0xfd   :  { %v250_v36 = vadd.f32 %v249_v33, %v3078_v0  ;;  %v251_v37 = vpop.f32.mrb[10].mxu0  ;;  %1209 = vmatprep.mubr.bf16.mxu0 %v712_v28  ;;  %v330_v50 = vadd.f32 %v329_v46, %v3078_v0  ;;  %v331_v51 = vpop.f32.mrb[10].mxu1 }
  0xfe   :  { %v252_v39 = vadd.f32 %v251_v37, %v3073_v30  ;;  %v253_v40 = vpop.f32.mrb[11].mxu0  ;;  %1210 = vmatmul.mubr.bf16.gmra.mrb[36].mxu0 %v711_v24  ;;  %v595_v47 = vmax.f32 %v248_v32, 0.0  ;;  %v659_v54 = vmax.f32 %v328_v45, 0.0  ;;  %v332_v55 = vadd.f32 %v331_v51, %v3073_v30  ;;  %v333_v56 = vpop.f32.mrb[11].mxu1  ;;  %v2708_v24 = vld [vmem:[#allocation2 + $0x164] ss:$8 sps:$4 sm:$0xff]  }
  0xff   :  { %v254_v43 = vadd.f32 %v253_v40, %v3078_v0  ;;  %1365 = vmatpush1.bf16.msra.mxu0 %v2694_v11  ;;  %v596_v52 = vmax.f32 %v250_v36, 0.0  ;;  %v660_v58 = vmax.f32 %v330_v50, 0.0  ;;  %v334_v59 = vadd.f32 %v333_v56, %v3078_v0 }
 0x100   :  { %v599_v48 = vmax.f32 %v252_v39, 0.0  ;;  %1366 = vmatprep.subr.bf16.mxu0 %v2699_v34  ;;  %v663_v63 = vmax.f32 %v332_v55, 0.0  ;;  %v2706_v39 = vld [vmem:[#allocation2 + $0x160] ss:$8 sps:$4 sm:$0xff]  }
 0x101   :  { %v600_v53 = vmax.f32 %v254_v43, 0.0  ;;  %v664_v7 = vmax.f32 %v334_v59, 0.0  ;;  %v2714_v59 = vld [vmem:[#allocation2 + $0x184] ss:$8 sps:$4 sm:$0xff]  }
 0x102   :  { %v715_v57 = vpack.c.bf16 %v599_v48, %v595_v47  ;;  %v3114_v10 = vpack.c.bf16 %v663_v63, %v659_v54  ;;  %v2709_v54 = vld [vmem:[#allocation2 + $0x170] ss:$8 sps:$4 sm:$0xff]  }
 0x103   :  { %v716_v60 = vpack.c.bf16 %v600_v53, %v596_v52  ;;  %v257_v61 = vpop.f32.mrb[12].mxu0  ;;  %1367 = vmatpush1.bf16.msra.mxu0 %v2697_v44  ;;  %v3117_v14 = vpack.c.bf16 %v664_v7, %v660_v58  ;;  %v337_v16 = vpop.f32.mrb[12].mxu1  ;;  %v2711_v44 = vld [vmem:[#allocation2 + $0x174] ss:$8 sps:$4 sm:$0xff]  }
 0x104   :  { %v258_v2 = vadd.f32 %v257_v61, %v3073_v30  ;;  %v259_v3 = vpop.f32.mrb[13].mxu0  ;;  %1368 = vmatprep.subr.bf16.mxu0 %v2702_v49  ;;  %v338_v20 = vadd.f32 %v337_v16, %v3073_v30  ;;  %v339_v21 = vpop.f32.mrb[13].mxu1  ;;  %v2712_v16 = vld [vmem:[#allocation2 + $0x180] ss:$8 sps:$4 sm:$0xff]  }
 0x105   :  { %v260_v8 = vadd.f32 %v259_v3, %v3078_v0  ;;  %v261_v9 = vpop.f32.mrb[14].mxu0  ;;  %1219 = vmatprep.mubr.bf16.mxu0 %v716_v60  ;;  %v340_v25 = vadd.f32 %v339_v21, %v3078_v0  ;;  %v341_v26 = vpop.f32.mrb[14].mxu1  ;;  %v2717_v21 = vld [vmem:[#allocation2 + $0x194] ss:$8 sps:$4 sm:$0xff]  }
 0x106   :  { %v262_v12 = vadd.f32 %v261_v9, %v3073_v30  ;;  %v263_v13 = vpop.f32.mrb[15].mxu0  ;;  %1220 = vmatmul.mubr.bf16.gmra.mrb[40].mxu0 %v715_v57  ;;  %v603_v22 = vmax.f32 %v258_v2, 0.0  ;;  %v667_v11 = vmax.f32 %v338_v20, 0.0  ;;  %v342_v31 = vadd.f32 %v341_v26, %v3073_v30  ;;  %v343_v32 = vpop.f32.mrb[15].mxu1 }
 0x107   :  { %v264_v17 = vadd.f32 %v263_v13, %v3078_v0  ;;  %1369 = vmatpush1.bf16.msra.mxu0 %v2700_v62  ;;  %v604_v28 = vmax.f32 %v260_v8, 0.0  ;;  %v668_v34 = vmax.f32 %v340_v25, 0.0  ;;  %v344_v35 = vadd.f32 %v343_v32, %v3078_v0  ;;  %v2715_v32 = vld [vmem:[#allocation2 + $0x190] ss:$8 sps:$4 sm:$0xff]  }
 0x108   :  { %v607_v23 = vmax.f32 %v262_v12, 0.0  ;;  %1370 = vmatprep.subr.bf16.mxu0 %v2705_v5  ;;  %v671_v40 = vmax.f32 %v342_v31, 0.0 }
 0x109   :  { %v608_v6 = vmax.f32 %v264_v17, 0.0  ;;  %v672_v45 = vmax.f32 %v344_v35, 0.0 }
 0x10a   :  { %v719_v33 = vpack.c.bf16 %v607_v23, %v603_v22  ;;  %v3126_v48 = vpack.c.bf16 %v671_v40, %v667_v11 }
 0x10b   :  { %v720_v36 = vpack.c.bf16 %v608_v6, %v604_v28  ;;  %v267_v37 = vpop.f32.mrb[16].mxu0  ;;  %1371 = vmatpush1.bf16.msra.mxu0 %v2703_v18  ;;  %v3129_v51 = vpack.c.bf16 %v672_v45, %v668_v34  ;;  %v347_v52 = vpop.f32.mrb[16].mxu1 }
 0x10c   :  { %v268_v42 = vadd.f32 %v267_v37, %v3073_v30  ;;  %v269_v43 = vpop.f32.mrb[17].mxu0  ;;  %1372 = vmatprep.subr.bf16.mxu0 %v2708_v24  ;;  %v348_v55 = vadd.f32 %v347_v52, %v3073_v30  ;;  %v349_v56 = vpop.f32.mrb[17].mxu1  ;;  %v2720_v37 = vld [vmem:[#allocation2 + $0x1a4] ss:$8 sps:$4 sm:$0xff]  }
 0x10d   :  { %v270_v46 = vadd.f32 %v269_v43, %v3078_v0  ;;  %v271_v47 = vpop.f32.mrb[18].mxu0  ;;  %1229 = vmatprep.mubr.bf16.mxu0 %v720_v36  ;;  %v350_v60 = vadd.f32 %v349_v56, %v3078_v0  ;;  %v351_v61 = vpop.f32.mrb[18].mxu1 }
 0x10e   :  { %v272_v49 = vadd.f32 %v271_v47, %v3073_v30  ;;  %v273_v50 = vpop.f32.mrb[19].mxu0  ;;  %1230 = vmatmul.mubr.bf16.gmra.mrb[44].mxu0 %v719_v33  ;;  %v611_v57 = vmax.f32 %v268_v42, 0.0  ;;  %v675_v2 = vmax.f32 %v348_v55, 0.0  ;;  %v352_v3 = vadd.f32 %v351_v61, %v3073_v30  ;;  %v353_v5 = vpop.f32.mrb[19].mxu1 }
 0x10f   :  { %v274_v53 = vadd.f32 %v273_v50, %v3078_v0  ;;  %1373 = vmatpush1.bf16.msra.mxu0 %v2706_v39  ;;  %v612_v62 = vmax.f32 %v270_v46, 0.0  ;;  %v676_v8 = vmax.f32 %v350_v60, 0.0  ;;  %v354_v9 = vadd.f32 %v353_v5, %v3078_v0 }
 0x110   :  { %v615_v58 = vmax.f32 %v272_v49, 0.0  ;;  %1374 = vmatprep.subr.bf16.mxu0 %v2711_v44  ;;  %v679_v17 = vmax.f32 %v352_v3, 0.0 }
 0x111   :  { %v616_v63 = vmax.f32 %v274_v53, 0.0  ;;  %v680_v22 = vmax.f32 %v354_v9, 0.0 }
 0x112   :  { %v723_v7 = vpack.c.bf16 %v615_v58, %v611_v57  ;;  %v3138_v25 = vpack.c.bf16 %v679_v17, %v675_v2  ;;  %v2723_v58 = vld [vmem:[#allocation2 + $0x1b4] ss:$8 sps:$4 sm:$0xff]   ;;  %v2726_v17 = vld [vmem:[#allocation2 + $0x1c4] ss:$8 sps:$4 sm:$0xff]  }
 0x113   :  { %v724_v12 = vpack.c.bf16 %v616_v63, %v612_v62  ;;  %v277_v13 = vpop.f32.mrb[20].mxu0  ;;  %1375 = vmatpush1.bf16.msra.mxu0 %v2709_v54  ;;  %v3141_v6 = vpack.c.bf16 %v680_v22, %v676_v8  ;;  %v357_v11 = vpop.f32.mrb[20].mxu1  ;;  %v2718_v54 = vld [vmem:[#allocation2 + $0x1a0] ss:$8 sps:$4 sm:$0xff]   ;;  %v2721_v8 = vld [vmem:[#allocation2 + $0x1b0] ss:$8 sps:$4 sm:$0xff]  }
 0x114   :  { %v278_v18 = vadd.f32 %v277_v13, %v3073_v30  ;;  %v279_v20 = vpop.f32.mrb[21].mxu0  ;;  %1376 = vmatprep.subr.bf16.mxu0 %v2714_v59  ;;  %v358_v33 = vadd.f32 %v357_v11, %v3073_v30  ;;  %v359_v34 = vpop.f32.mrb[21].mxu1 }
 0x115   :  { %v280_v23 = vadd.f32 %v279_v20, %v3078_v0  ;;  %v281_v24 = vpop.f32.mrb[22].mxu0  ;;  %1239 = vmatprep.mubr.bf16.mxu0 %v724_v12  ;;  %v360_v39 = vadd.f32 %v359_v34, %v3078_v0  ;;  %v361_v40 = vpop.f32.mrb[22].mxu1  ;;  %v2724_v34 = vld [vmem:[#allocation2 + $0x1c0] ss:$8 sps:$4 sm:$0xff]  }
 0x116   :  { %v282_v26 = vadd.f32 %v281_v24, %v3073_v30  ;;  %v283_v28 = vpop.f32.mrb[23].mxu0  ;;  %1240 = vmatmul.mubr.bf16.gmra.mrb[48].mxu0 %v723_v7  ;;  %v619_v35 = vmax.f32 %v278_v18, 0.0  ;;  %v683_v44 = vmax.f32 %v358_v33, 0.0  ;;  %v362_v45 = vadd.f32 %v361_v40, %v3073_v30  ;;  %v363_v46 = vpop.f32.mrb[23].mxu1  ;;  %v2729_v40 = vld [vmem:[#allocation2 + $0x1d4] ss:$8 sps:$4 sm:$0xff]  }
 0x117   :  { %v284_v31 = vadd.f32 %v283_v28, %v3078_v0  ;;  %1377 = vmatpush1.bf16.msra.mxu0 %v2712_v16  ;;  %v620_v42 = vmax.f32 %v280_v23, 0.0  ;;  %v684_v49 = vmax.f32 %v360_v39, 0.0  ;;  %v364_v50 = vadd.f32 %v363_v46, %v3078_v0 }
 0x118   :  { %v623_v36 = vmax.f32 %v282_v26, 0.0  ;;  %1378 = vmatprep.subr.bf16.mxu0 %v2717_v21  ;;  %v687_v55 = vmax.f32 %v362_v45, 0.0 }
 0x119   :  { %v624_v43 = vmax.f32 %v284_v31, 0.0  ;;  %v688_v59 = vmax.f32 %v364_v50, 0.0 }
 0x11a   :  { %v727_v47 = vpack.c.bf16 %v623_v36, %v619_v35  ;;  %v3150_v62 = vpack.c.bf16 %v687_v55, %v683_v44  ;;  %v105_v55 = vsub.s32 2, %v3061_v15 }
 0x11b   :  { %v728_v52 = vpack.c.bf16 %v624_v43, %v620_v42  ;;  %v287_v53 = vpop.f32.mrb[24].mxu0  ;;  %1379 = vmatpush1.bf16.msra.mxu0 %v2715_v32  ;;  %v3153_v3 = vpack.c.bf16 %v688_v59, %v684_v49  ;;  %v367_v5 = vpop.f32.mrb[24].mxu1 }
 0x11c   :  { %v288_v56 = vadd.f32 %v287_v53, %v3073_v30  ;;  %v289_v57 = vpop.f32.mrb[25].mxu0  ;;  %1380 = vmatprep.subr.bf16.mxu0 %v2720_v37  ;;  %v368_v9 = vadd.f32 %v367_v5, %v3073_v30  ;;  %v369_v12 = vpop.f32.mrb[25].mxu1 }
 0x11d   :  { %v290_v60 = vadd.f32 %v289_v57, %v3078_v0  ;;  %v291_v61 = vpop.f32.mrb[26].mxu0  ;;  %1249 = vmatprep.mubr.bf16.mxu0 %v728_v52  ;;  %v370_v18 = vadd.f32 %v369_v12, %v3078_v0  ;;  %v371_v20 = vpop.f32.mrb[26].mxu1  ;;  %v2727_v52 = vld [vmem:[#allocation2 + $0x1d0] ss:$8 sps:$4 sm:$0xff]  }
 0x11e   :  { %v292_v63 = vadd.f32 %v291_v61, %v3073_v30  ;;  %v293_v2 = vpop.f32.mrb[27].mxu0  ;;  %1250 = vmatmul.mubr.bf16.gmra.mrb[52].mxu0 %v727_v47  ;;  %v627_v13 = vmax.f32 %v288_v56, 0.0  ;;  %v691_v23 = vmax.f32 %v368_v9, 0.0  ;;  %v372_v24 = vadd.f32 %v371_v20, %v3073_v30  ;;  %v373_v26 = vpop.f32.mrb[27].mxu1 }
 0x11f   :  { %v294_v7 = vadd.f32 %v293_v2, %v3078_v0  ;;  %1381 = vmatpush1.bf16.msra.mxu0 %v2718_v54  ;;  %v628_v21 = vmax.f32 %v290_v60, 0.0  ;;  %v692_v11 = vmax.f32 %v370_v18, 0.0  ;;  %v374_v31 = vadd.f32 %v373_v26, %v3078_v0  ;;  %v2732_v60 = vld [vmem:[#allocation2 + $0x1e4] ss:$8 sps:$4 sm:$0xff]   ;;  %v2730_v18 = vld [vmem:[#allocation2 + $0x1e0] ss:$8 sps:$4 sm:$0xff]  }
 0x120   :  { %v631_v16 = vmax.f32 %v292_v63, 0.0  ;;  %1382 = vmatprep.subr.bf16.mxu0 %v2723_v58  ;;  %v695_v35 = vmax.f32 %v372_v24, 0.0  ;;  %v109_v61 = vsub.s32 3, %v3061_v15  ;;  %v3175_v20 = vrot.slane %v3067_v27, %v105_v55 }
 0x121   :  { %v632_v22 = vmax.f32 %v294_v7, 0.0  ;;  %v696_v39 = vmax.f32 %v374_v31, 0.0 }
 0x122   :  { %v731_v28 = vpack.c.bf16 %v631_v16, %v627_v13  ;;  %v3162_v44 = vpack.c.bf16 %v695_v35, %v691_v23  ;;  %v2735_v23 = vld [vmem:[#allocation2 + $0x1f4] ss:$8 sps:$4 sm:$0xff]  }
 0x123   :  { %v732_v32 = vpack.c.bf16 %v632_v22, %v628_v21  ;;  %v297_v33 = vpop.f32.mrb[28].mxu0  ;;  %1383 = vmatpush1.bf16.msra.mxu0 %v2721_v8  ;;  %v3165_v47 = vpack.c.bf16 %v696_v39, %v692_v11  ;;  %v377_v49 = vpop.f32.mrb[28].mxu1  ;;  %v3178_v22 = vrot.slane %v3067_v27, %v109_v61  ;;  %v2733_v11 = vld [vmem:[#allocation2 + $0x1f0] ss:$8 sps:$4 sm:$0xff]  }
 0x124   :  { %v298_v36 = vadd.f32 %v297_v33, %v3073_v30  ;;  %v299_v37 = vpop.f32.mrb[29].mxu0  ;;  %1384 = vmatprep.subr.bf16.mxu0 %v2726_v17  ;;  %v378_v53 = vadd.f32 %v377_v49, %v3073_v30  ;;  %v379_v54 = vpop.f32.mrb[29].mxu1 }
 0x125   :  { %v300_v42 = vadd.f32 %v299_v37, %v3078_v0  ;;  %v301_v43 = vpop.f32.mrb[30].mxu0  ;;  %1259 = vmatprep.mubr.bf16.mxu0 %v732_v32  ;;  %v380_v58 = vadd.f32 %v379_v54, %v3078_v0  ;;  %v381_v59 = vpop.f32.mrb[30].mxu1 }
 0x126   :  { %v302_v45 = vadd.f32 %v301_v43, %v3073_v30  ;;  %v303_v46 = vpop.f32.mrb[31].mxu0  ;;  %1260 = vmatmul.mubr.bf16.gmra.mrb[56].mxu0 %v731_v28  ;;  %v635_v56 = vmax.f32 %v298_v36, 0.0  ;;  %v699_v5 = vmax.f32 %v378_v53, 0.0  ;;  %v382_v7 = vadd.f32 %v381_v59, %v3073_v30  ;;  %v383_v8 = vpop.f32.mrb[31].mxu1 }
 0x127   :  { %v304_v50 = vadd.f32 %v303_v46, %v3078_v0  ;;  %1385 = vmatpush1.bf16.msra.mxu0 %v2724_v34  ;;  %v636_v63 = vmax.f32 %v300_v42, 0.0  ;;  %v700_v12 = vmax.f32 %v380_v58, 0.0  ;;  %v384_v13 = vadd.f32 %v383_v8, %v3078_v0 }
 0x128   :  { %v639_v57 = vmax.f32 %v302_v45, 0.0  ;;  %1386 = vmatprep.subr.bf16.mxu0 %v2729_v40  ;;  %v703_v17 = vmax.f32 %v382_v7, 0.0 }
 0x129   :  { %v640_v2 = vmax.f32 %v304_v50, 0.0  ;;  %v704_v21 = vmax.f32 %v384_v13, 0.0 }
 0x12a   :  { %v735_v9 = vpack.c.bf16 %v639_v57, %v635_v56  ;;  %v3180_v30 = vpack.c.bf16 %v703_v17, %v699_v5 }
 0x12b   :  { %v736_v16 = vpack.c.bf16 %v640_v2, %v636_v63  ;;  %1387 = vmatpush1.bf16.msra.mxu0 %v2727_v52  ;;  %v3182_v24 = vpack.c.bf16 %v704_v21, %v700_v12  ;;  %v420_v0 = vpop.f32.mrb[32].mxu1 }
 0x12c   :  { %1388 = vmatprep.subr.bf16.mxu0 %v2732_v60  ;;  %v421_v26 = vadd.f32 %v420_v0, %v3175_v20  ;;  %v422_v28 = vpop.f32.mrb[33].mxu1 }
 0x12d   :  { %1269 = vmatprep.mubr.bf16.mxu0 %v736_v16  ;;  %v423_v31 = vadd.f32 %v422_v28, %v3178_v22  ;;  %v424_v32 = vpop.f32.mrb[34].mxu1 }
 0x12e   :  { %1270 = vmatmul.mubr.bf16.gmra.mrb[60].mxu0 %v735_v9  ;;  %v581_v27 = vmax.f32 %v421_v26, 0.0  ;;  %v425_v33 = vadd.f32 %v424_v32, %v3175_v20  ;;  %v426_v34 = vpop.f32.mrb[35].mxu1 }
 0x12f   :  { %1279 = vmatprep.mubr.bf16.mxu0 %v3093_v4  ;;  %1389 = vmatpush1.bf16.msra.mxu0 %v2730_v18  ;;  %v582_v35 = vmax.f32 %v423_v31, 0.0  ;;  %v427_v36 = vadd.f32 %v426_v34, %v3178_v22 }
 0x130   :  { %1390 = vmatprep.subr.bf16.mxu0 %v2735_v23  ;;  %v585_v37 = vmax.f32 %v425_v33, 0.0 }
 0x131   :  { %v586_v39 = vmax.f32 %v427_v36, 0.0  ;;  %v2736_v36 = vld [vmem:[%s3549_s5 + $0x40] sm:$0xff]  }
 0x132   :  { %v3189_v4 = vpack.c.bf16 %v585_v37, %v581_v27  ;;  %v2737_v37 = vld [vmem:[%s3549_s5] sm:$0xff]   ;;  %2388 = vmatprep.subr.bf16.mxu1 %v2736_v36 }
 0x133   :  { %1391 = vmatpush1.bf16.msra.mxu0 %v2733_v11  ;;  %v3192_v40 = vpack.c.bf16 %v586_v39, %v582_v35  ;;  %v430_v42 = vpop.f32.mrb[36].mxu1  ;;  %2389 = vmatpush3.bf16.msra.mxu1 %v2737_v37 }
 0x134   :  { %v431_v43 = vadd.f32 %v430_v42, %v3175_v20  ;;  %v432_v45 = vpop.f32.mrb[37].mxu1 }
 0x135   :  { %v433_v46 = vadd.f32 %v432_v45, %v3178_v22  ;;  %v434_v49 = vpop.f32.mrb[38].mxu1 }
 0x136   :  { %1280 = vmatmul.mubr.bf16.gmra.mrb[64].mxu0 %v3090_v1  ;;  %v589_v50 = vmax.f32 %v431_v43, 0.0  ;;  %v435_v52 = vadd.f32 %v434_v49, %v3175_v20  ;;  %v436_v53 = vpop.f32.mrb[39].mxu1 }
 0x137   :  { %1289 = vmatprep.mubr.bf16.mxu0 %v3105_v41  ;;  %v590_v54 = vmax.f32 %v433_v46, 0.0  ;;  %v437_v55 = vadd.f32 %v436_v53, %v3178_v22 }
 0x138   :  { %v593_v56 = vmax.f32 %v435_v52, 0.0 }
 0x139   :  { %v594_v1 = vmax.f32 %v437_v55, 0.0 }
 0x13a   :  { %v3199_v57 = vpack.c.bf16 %v593_v56, %v589_v50 }
 0x13b   :  { %v3202_v41 = vpack.c.bf16 %v594_v1, %v590_v54  ;;  %v440_v58 = vpop.f32.mrb[40].mxu1 }
 0x13c   :  { %v441_v59 = vadd.f32 %v440_v58, %v3175_v20  ;;  %v442_v60 = vpop.f32.mrb[41].mxu1 }
 0x13d   :  { %v443_v61 = vadd.f32 %v442_v60, %v3178_v22  ;;  %v444_v63 = vpop.f32.mrb[42].mxu1 }
 0x13e   :  { %1290 = vmatmul.mubr.bf16.gmra.mrb[68].mxu0 %v3102_v38  ;;  %v597_v2 = vmax.f32 %v441_v59, 0.0  ;;  %v445_v5 = vadd.f32 %v444_v63, %v3175_v20  ;;  %v446_v7 = vpop.f32.mrb[43].mxu1 }
 0x13f   :  { %1299 = vmatprep.mubr.bf16.mxu0 %v3117_v14  ;;  %v598_v8 = vmax.f32 %v443_v61, 0.0  ;;  %v447_v9 = vadd.f32 %v446_v7, %v3178_v22 }
 0x140   :  { %v601_v12 = vmax.f32 %v445_v5, 0.0 }
 0x141   :  { %v602_v38 = vmax.f32 %v447_v9, 0.0 }
 0x142   :  { %v3209_v13 = vpack.c.bf16 %v601_v12, %v597_v2 }
 0x143   :  { %v3212_v14 = vpack.c.bf16 %v602_v38, %v598_v8  ;;  %v450_v16 = vpop.f32.mrb[44].mxu1  ;;  %v2738_v38 = vld [vmem:[%s3549_s5 + $0x48] sm:$0xff]  }
 0x144   :  { %v451_v17 = vadd.f32 %v450_v16, %v3175_v20  ;;  %v452_v18 = vpop.f32.mrb[45].mxu1  ;;  %v2739_v16 = vld [vmem:[%s3549_s5 + $0x8] sm:$0xff]   ;;  %2390 = vmatprep.subr.bf16.mxu1 %v2738_v38 }
 0x145   :  { %v453_v21 = vadd.f32 %v452_v18, %v3178_v22  ;;  %v454_v23 = vpop.f32.mrb[46].mxu1  ;;  %2391 = vmatpush3.bf16.msra.mxu1 %v2739_v16  ;;  %v2746_v38 = vld [vmem:[%s3549_s5 + $0x68] sm:$0xff]  }
 0x146   :  { %1300 = vmatmul.mubr.bf16.gmra.mrb[72].mxu0 %v3114_v10  ;;  %v605_v0 = vmax.f32 %v451_v17, 0.0  ;;  %v455_v26 = vadd.f32 %v454_v23, %v3175_v20  ;;  %v456_v28 = vpop.f32.mrb[47].mxu1 }
 0x147   :  { %1309 = vmatprep.mubr.bf16.mxu0 %v3129_v51  ;;  %v606_v11 = vmax.f32 %v453_v21, 0.0  ;;  %v457_v31 = vadd.f32 %v456_v28, %v3178_v22 }
 0x148   :  { %v609_v32 = vmax.f32 %v455_v26, 0.0 }
 0x149   :  { %v610_v10 = vmax.f32 %v457_v31, 0.0 }
 0x14a   :  { %v3219_v27 = vpack.c.bf16 %v609_v32, %v605_v0 }
 0x14b   :  { %v3222_v51 = vpack.c.bf16 %v610_v10, %v606_v11  ;;  %v460_v33 = vpop.f32.mrb[48].mxu1 }
 0x14c   :  { %v461_v34 = vadd.f32 %v460_v33, %v3175_v20  ;;  %v462_v35 = vpop.f32.mrb[49].mxu1 }
 0x14d   :  { %v463_v39 = vadd.f32 %v462_v35, %v3178_v22  ;;  %v464_v42 = vpop.f32.mrb[50].mxu1 }
 0x14e   :  { %1310 = vmatmul.mubr.bf16.gmra.mrb[76].mxu0 %v3126_v48  ;;  %v613_v48 = vmax.f32 %v461_v34, 0.0  ;;  %v465_v43 = vadd.f32 %v464_v42, %v3175_v20  ;;  %v466_v45 = vpop.f32.mrb[51].mxu1 }
 0x14f   :  { %1319 = vmatprep.mubr.bf16.mxu0 %v3141_v6  ;;  %v614_v6 = vmax.f32 %v463_v39, 0.0  ;;  %v467_v46 = vadd.f32 %v466_v45, %v3178_v22 }
 0x150   :  { %v617_v49 = vmax.f32 %v465_v43, 0.0 }
 0x151   :  { %v618_v50 = vmax.f32 %v467_v46, 0.0  ;;  %v2740_v46 = vld [vmem:[%s3549_s5 + $0x50] sm:$0xff]  }
 0x152   :  { %v3235_v52 = vpack.c.bf16 %v617_v49, %v613_v48  ;;  %v2741_v49 = vld [vmem:[%s3549_s5 + $0x10] sm:$0xff]   ;;  %2392 = vmatprep.subr.bf16.mxu1 %v2740_v46 }
 0x153   :  { %v3238_v53 = vpack.c.bf16 %v618_v50, %v614_v6  ;;  %v470_v54 = vpop.f32.mrb[52].mxu1  ;;  %v2742_v50 = vld [vmem:[%s3549_s5 + $0x58] sm:$0xff]   ;;  %2393 = vmatpush3.bf16.msra.mxu1 %v2741_v49 }
 0x154   :  { %v471_v55 = vadd.f32 %v470_v54, %v3175_v20  ;;  %v472_v56 = vpop.f32.mrb[53].mxu1  ;;  %2394 = vmatprep.subr.bf16.mxu1 %v2742_v50 }
 0x155   :  { %v473_v1 = vadd.f32 %v472_v56, %v3178_v22  ;;  %v474_v58 = vpop.f32.mrb[54].mxu1 }
 0x156   :  { %1320 = vmatmul.mubr.bf16.gmra.mrb[80].mxu0 %v3138_v25  ;;  %v621_v59 = vmax.f32 %v471_v55, 0.0  ;;  %v475_v60 = vadd.f32 %v474_v58, %v3175_v20  ;;  %v476_v61 = vpop.f32.mrb[55].mxu1 }
 0x157   :  { %1329 = vmatprep.mubr.bf16.mxu0 %v3153_v3  ;;  %v622_v63 = vmax.f32 %v473_v1, 0.0  ;;  %v477_v2 = vadd.f32 %v476_v61, %v3178_v22 }
 0x158   :  { %v625_v5 = vmax.f32 %v475_v60, 0.0  ;;  %v2743_v60 = vld [vmem:[%s3549_s5 + $0x18] sm:$0xff]  }
 0x159   :  { %v626_v25 = vmax.f32 %v477_v2, 0.0  ;;  %2395 = vmatpush3.bf16.msra.mxu1 %v2743_v60 }
 0x15a   :  { %v3245_v7 = vpack.c.bf16 %v625_v5, %v621_v59 }
 0x15b   :  { %v3248_v3 = vpack.c.bf16 %v626_v25, %v622_v63  ;;  %v480_v8 = vpop.f32.mrb[56].mxu1 }
 0x15c   :  { %v481_v9 = vadd.f32 %v480_v8, %v3175_v20  ;;  %v482_v12 = vpop.f32.mrb[57].mxu1  ;;  %v2745_v8 = vld [vmem:[%s3549_s5 + $0x20] sm:$0xff]  }
 0x15d   :  { %v483_v17 = vadd.f32 %v482_v12, %v3178_v22  ;;  %v484_v18 = vpop.f32.mrb[58].mxu1 }
 0x15e   :  { %1330 = vmatmul.mubr.bf16.gmra.mrb[84].mxu0 %v3150_v62  ;;  %v629_v62 = vmax.f32 %v481_v9, 0.0  ;;  %v485_v21 = vadd.f32 %v484_v18, %v3175_v20  ;;  %v486_v23 = vpop.f32.mrb[59].mxu1 }
 0x15f   :  { %1339 = vmatprep.mubr.bf16.mxu0 %v3165_v47  ;;  %v630_v47 = vmax.f32 %v483_v17, 0.0  ;;  %v487_v0 = vadd.f32 %v486_v23, %v3178_v22 }
 0x160   :  { %v633_v26 = vmax.f32 %v485_v21, 0.0 }
 0x161   :  { %v634_v28 = vmax.f32 %v487_v0, 0.0 }
 0x162   :  { %v3261_v11 = vpack.c.bf16 %v633_v26, %v629_v62 }
 0x163   :  { %v3264_v31 = vpack.c.bf16 %v634_v28, %v630_v47  ;;  %v490_v32 = vpop.f32.mrb[60].mxu1  ;;  %v2747_v47 = vld [vmem:[%s3549_s5 + $0x28] sm:$0xff]  }
 0x164   :  { %v491_v10 = vadd.f32 %v490_v32, %v3175_v20  ;;  %v492_v33 = vpop.f32.mrb[61].mxu1 }
 0x165   :  { %v493_v34 = vadd.f32 %v492_v33, %v3178_v22  ;;  %v494_v35 = vpop.f32.mrb[62].mxu1  ;;  %v2749_v33 = vld [vmem:[%s3549_s5 + $0x30] sm:$0xff]  }
 0x166   :  { %1340 = vmatmul.mubr.bf16.gmra.mrb[88].mxu0 %v3162_v44  ;;  %v637_v36 = vmax.f32 %v491_v10, 0.0  ;;  %v495_v37 = vadd.f32 %v494_v35, %v3175_v20  ;;  %v496_v39 = vpop.f32.mrb[63].mxu1 }
 0x167   :  { %1349 = vmatprep.mubr.bf16.mxu0 %v3182_v24  ;;  %v638_v42 = vmax.f32 %v493_v34, 0.0  ;;  %v497_v48 = vadd.f32 %v496_v39, %v3178_v22 }
 0x168   :  { %v641_v43 = vmax.f32 %v495_v37, 0.0 }
 0x169   :  { %v642_v44 = vmax.f32 %v497_v48, 0.0 }
 0x16a   :  { %v3271_v45 = vpack.c.bf16 %v641_v43, %v637_v36  ;;  %v2750_v36 = vld [vmem:[%s3549_s5 + $0x78] sm:$0xff]  }
 0x16b   :  { %v3274_v24 = vpack.c.bf16 %v642_v44, %v638_v42  ;;  %v500_v6 = vpop.f32.mrb[64].mxu1 }
 0x16c   :  { %v501_v54 = vadd.f32 %v500_v6, %v3175_v20  ;;  %v2751_v6 = vld [vmem:[%s3549_s5 + $0x38] sm:$0xff]  }
 0x16e   :  { %1350 = vmatmul.mubr.bf16.gmra.mrb[92].mxu0 %v3180_v30  ;;  %v502_v30 = vpop.f32.mrb[65].mxu1  ;;  %v645_v1 = vmax.f32 %v501_v54, 0.0 }
 0x16f   :  { %1392 = vmatprep.mubr.bf16.mxu0 %v3192_v40  ;;  %v503_v55 = vadd.f32 %v502_v30, %v3178_v22  ;;  %v504_v56 = vpop.f32.mrb[66].mxu1  ;;  %v2744_v40 = vld [vmem:[%s3549_s5 + $0x60] sm:$0xff]  }
 0x170   :  { %v505_v58 = vadd.f32 %v504_v56, %v3175_v20  ;;  %v506_v59 = vpop.f32.mrb[67].mxu1  ;;  %2396 = vmatprep.subr.bf16.mxu1 %v2744_v40 }
 0x171   :  { %v646_v61 = vmax.f32 %v503_v55, 0.0  ;;  %v507_v63 = vadd.f32 %v506_v59, %v3178_v22  ;;  %2397 = vmatpush3.bf16.msra.mxu1 %v2745_v8 }
 0x172   :  { %v649_v2 = vmax.f32 %v505_v58, 0.0  ;;  %2398 = vmatprep.subr.bf16.mxu1 %v2746_v38 }
 0x173   :  { %v650_v5 = vmax.f32 %v507_v63, 0.0  ;;  %v510_v12 = vpop.f32.mrb[68].mxu1 }
 0x174   :  { %v3296_v25 = vpack.c.bf16 %v649_v2, %v645_v1  ;;  %v511_v16 = vadd.f32 %v510_v12, %v3175_v20  ;;  %v512_v17 = vpop.f32.mrb[69].mxu1 }
 0x175   :  { %v3302_v9 = vpack.c.bf16 %v650_v5, %v646_v61  ;;  %v513_v18 = vadd.f32 %v512_v17, %v3178_v22  ;;  %v514_v62 = vpop.f32.mrb[70].mxu1  ;;  %2399 = vmatpush3.bf16.msra.mxu1 %v2747_v47 }
 0x176   :  { %1393 = vmatmul.mubr.bf16.vlgmr.msra.gmra.mrb[32].mxu0 %v3189_v4  ;;  %v653_v21 = vmax.f32 %v511_v16, 0.0  ;;  %v515_v23 = vadd.f32 %v514_v62, %v3175_v20  ;;  %v516_v4 = vpop.f32.mrb[71].mxu1 }
 0x177   :  { %1402 = vmatprep.mubr.bf16.mxu0 %v3202_v41  ;;  %v654_v0 = vmax.f32 %v513_v18, 0.0  ;;  %v517_v26 = vadd.f32 %v516_v4, %v3178_v22  ;;  %v2748_v41 = vld [vmem:[%s3549_s5 + $0x70] sm:$0xff]  }
 0x178   :  { %v657_v28 = vmax.f32 %v515_v23, 0.0  ;;  %2400 = vmatprep.subr.bf16.mxu1 %v2748_v41 }
 0x179   :  { %v658_v32 = vmax.f32 %v517_v26, 0.0  ;;  %2401 = vmatpush3.bf16.msra.mxu1 %v2749_v33 }
 0x17a   :  { %v3318_v10 = vpack.c.bf16 %v657_v28, %v653_v21  ;;  %2402 = vmatprep.subr.bf16.mxu1 %v2750_v36 }
 0x17b   :  { %v3324_v34 = vpack.c.bf16 %v658_v32, %v654_v0  ;;  %v520_v35 = vpop.f32.mrb[72].mxu1 }
 0x17c   :  { %v521_v37 = vadd.f32 %v520_v35, %v3175_v20  ;;  %v522_v39 = vpop.f32.mrb[73].mxu1 }
 0x17d   :  { %v523_v42 = vadd.f32 %v522_v39, %v3178_v22  ;;  %v524_v48 = vpop.f32.mrb[74].mxu1  ;;  %2403 = vmatpush3.bf16.msra.mxu1 %v2751_v6 }
 0x17e   :  { %1403 = vmatmul.mubr.bf16.gmra.mrb[36].mxu0 %v3199_v57  ;;  %v661_v43 = vmax.f32 %v521_v37, 0.0  ;;  %v525_v44 = vadd.f32 %v524_v48, %v3175_v20  ;;  %v526_v57 = vpop.f32.mrb[75].mxu1 }
 0x17f   :  { %1412 = vmatprep.mubr.bf16.mxu0 %v3212_v14  ;;  %v662_v46 = vmax.f32 %v523_v42, 0.0  ;;  %v527_v49 = vadd.f32 %v526_v57, %v3178_v22 }
 0x180   :  { %v665_v14 = vmax.f32 %v525_v44, 0.0 }
 0x181   :  { %v666_v50 = vmax.f32 %v527_v49, 0.0 }
 0x182   :  { %v3337_v54 = vpack.c.bf16 %v665_v14, %v661_v43 }
 0x183   :  { %v3340_v30 = vpack.c.bf16 %v666_v50, %v662_v46  ;;  %v530_v55 = vpop.f32.mrb[76].mxu1 }
 0x184   :  { %v531_v56 = vadd.f32 %v530_v55, %v3175_v20  ;;  %v532_v1 = vpop.f32.mrb[77].mxu1 }
 0x185   :  { %v533_v58 = vadd.f32 %v532_v1, %v3178_v22  ;;  %v534_v59 = vpop.f32.mrb[78].mxu1 }
 0x186   :  { %1413 = vmatmul.mubr.bf16.gmra.mrb[40].mxu0 %v3209_v13  ;;  %v669_v60 = vmax.f32 %v531_v56, 0.0  ;;  %v535_v61 = vadd.f32 %v534_v59, %v3175_v20  ;;  %v536_v63 = vpop.f32.mrb[79].mxu1 }
 0x187   :  { %1422 = vmatprep.mubr.bf16.mxu0 %v3222_v51  ;;  %v670_v40 = vmax.f32 %v533_v58, 0.0  ;;  %v537_v2 = vadd.f32 %v536_v63, %v3178_v22 }
 0x188   :  { %v673_v5 = vmax.f32 %v535_v61, 0.0 }
 0x189   :  { %v674_v13 = vmax.f32 %v537_v2, 0.0 }
 0x18a   :  { %v3347_v8 = vpack.c.bf16 %v673_v5, %v669_v60 }
 0x18b   :  { %v3350_v51 = vpack.c.bf16 %v674_v13, %v670_v40  ;;  %v540_v12 = vpop.f32.mrb[80].mxu1 }
 0x18c   :  { %v541_v38 = vadd.f32 %v540_v12, %v3175_v20  ;;  %v542_v16 = vpop.f32.mrb[81].mxu1 }
 0x18d   :  { %v543_v17 = vadd.f32 %v542_v16, %v3178_v22  ;;  %v544_v18 = vpop.f32.mrb[82].mxu1 }
 0x18e   :  { %1423 = vmatmul.mubr.bf16.gmra.mrb[44].mxu0 %v3219_v27  ;;  %v677_v62 = vmax.f32 %v541_v38, 0.0  ;;  %v545_v21 = vadd.f32 %v544_v18, %v3175_v20  ;;  %v546_v23 = vpop.f32.mrb[83].mxu1 }
 0x18f   :  { %1432 = vmatprep.mubr.bf16.mxu0 %v3238_v53  ;;  %v678_v4 = vmax.f32 %v543_v17, 0.0  ;;  %v547_v47 = vadd.f32 %v546_v23, %v3178_v22 }
 0x190   :  { %v681_v0 = vmax.f32 %v545_v21, 0.0 }
 0x191   :  { %v682_v27 = vmax.f32 %v547_v47, 0.0 }
 0x192   :  { %v757_v26 = vpack.c.bf16 %v681_v0, %v677_v62 }
 0x193   :  { %v758_v41 = vpack.c.bf16 %v682_v27, %v678_v4  ;;  %v550_v53 = vpop.f32.mrb[84].mxu1 }
 0x194   :  { %v551_v28 = vadd.f32 %v550_v53, %v3175_v20  ;;  %v552_v32 = vpop.f32.mrb[85].mxu1 }
 0x195   :  { %v553_v33 = vadd.f32 %v552_v32, %v3178_v22  ;;  %v554_v35 = vpop.f32.mrb[86].mxu1 }
 0x196   :  { %1433 = vmatmul.mubr.bf16.gmra.mrb[48].mxu0 %v3235_v52  ;;  %v685_v36 = vmax.f32 %v551_v28, 0.0  ;;  %v555_v37 = vadd.f32 %v554_v35, %v3175_v20  ;;  %v556_v39 = vpop.f32.mrb[87].mxu1 }
 0x197   :  { %1442 = vmatprep.mubr.bf16.mxu0 %v3248_v3  ;;  %v686_v42 = vmax.f32 %v553_v33, 0.0  ;;  %v557_v48 = vadd.f32 %v556_v39, %v3178_v22 }
 0x198   :  { %v689_v43 = vmax.f32 %v555_v37, 0.0 }
 0x199   :  { %v690_v44 = vmax.f32 %v557_v48, 0.0 }
 0x19a   :  { %v761_v52 = vpack.c.bf16 %v689_v43, %v685_v36 }
 0x19b   :  { %v762_v57 = vpack.c.bf16 %v690_v44, %v686_v42  ;;  %v560_v3 = vpop.f32.mrb[88].mxu1 }
 0x19c   :  { %v561_v6 = vadd.f32 %v560_v3, %v3175_v20  ;;  %v562_v46 = vpop.f32.mrb[89].mxu1 }
 0x19d   :  { %v563_v49 = vadd.f32 %v562_v46, %v3178_v22  ;;  %v564_v14 = vpop.f32.mrb[90].mxu1 }
 0x19e   :  { %1443 = vmatmul.mubr.bf16.gmra.mrb[52].mxu0 %v3245_v7  ;;  %v693_v50 = vmax.f32 %v561_v6, 0.0  ;;  %v565_v55 = vadd.f32 %v564_v14, %v3175_v20  ;;  %v566_v56 = vpop.f32.mrb[91].mxu1 }
 0x19f   :  { %1452 = vmatprep.mubr.bf16.mxu0 %v3264_v31  ;;  %v694_v1 = vmax.f32 %v563_v49, 0.0  ;;  %v567_v58 = vadd.f32 %v566_v56, %v3178_v22 }
 0x1a0   :  { %v697_v59 = vmax.f32 %v565_v55, 0.0 }
 0x1a1   :  { %v698_v60 = vmax.f32 %v567_v58, 0.0 }
 0x1a2   :  { %v765_v7 = vpack.c.bf16 %v697_v59, %v693_v50 }
 0x1a3   :  { %v766_v61 = vpack.c.bf16 %v698_v60, %v694_v1  ;;  %v570_v31 = vpop.f32.mrb[92].mxu1 }
 0x1a4   :  { %v571_v63 = vadd.f32 %v570_v31, %v3175_v20  ;;  %v572_v40 = vpop.f32.mrb[93].mxu1 }
 0x1a5   :  { %v573_v2 = vadd.f32 %v572_v40, %v3178_v22  ;;  %v574_v5 = vpop.f32.mrb[94].mxu1 }
 0x1a6   :  { %1453 = vmatmul.mubr.bf16.gmra.mrb[56].mxu0 %v3261_v11  ;;  %v701_v13 = vmax.f32 %v571_v63, 0.0  ;;  %v575_v12 = vadd.f32 %v574_v5, %v3175_v20  ;;  %v576_v38 = vpop.f32.mrb[95].mxu1  ;;  %v835_v20 = vld [vmem:[%s3548_s4] sm:$0x3] }
 0x1a7   :  { %1462 = vmatprep.mubr.bf16.mxu0 %v3274_v24  ;;  %v702_v16 = vmax.f32 %v573_v2, 0.0  ;;  %v577_v17 = vadd.f32 %v576_v38, %v3178_v22  ;;  %v3389_v22 = vrot.slane %v835_v20, %v97_v19 }
 0x1a8   :  { %v705_v18 = vmax.f32 %v575_v12, 0.0 }
 0x1a9   :  { %v706_v62 = vmax.f32 %v577_v17, 0.0 }
 0x1aa   :  { %v769_v11 = vpack.c.bf16 %v705_v18, %v701_v13 }
 0x1ab   :  { %v770_v21 = vpack.c.bf16 %v706_v62, %v702_v16 }
 0x1ae   :  { %1463 = vmatmul.mubr.bf16.gmra.mrb[60].mxu0 %v3271_v45  ;;  %v3393_v45 = vrot.slane %v835_v20, %v101_v29 }
 0x1af   :  { %1472 = vmatprep.mubr.bf16.mxu0 %v3302_v9 }
 0x1b6   :  { %1473 = vmatmul.mubr.bf16.gmra.mrb[64].mxu0 %v3296_v25 }
 0x1b7   :  { %1482 = vmatprep.mubr.bf16.mxu0 %v3324_v34 }
 0x1be   :  { %1483 = vmatmul.mubr.bf16.gmra.mrb[68].mxu0 %v3318_v10 }
 0x1bf   :  { %1492 = vmatprep.mubr.bf16.mxu0 %v3340_v30 }
 0x1c6   :  { %1493 = vmatmul.mubr.bf16.gmra.mrb[72].mxu0 %v3337_v54 }
 0x1c7   :  { %1502 = vmatprep.mubr.bf16.mxu0 %v3350_v51 }
 0x1ce   :  { %1503 = vmatmul.mubr.bf16.gmra.mrb[76].mxu0 %v3347_v8 }
 0x1cf   :  { %1512 = vmatprep.mubr.bf16.mxu0 %v758_v41 }
 0x1d6   :  { %1513 = vmatmul.mubr.bf16.gmra.mrb[80].mxu0 %v757_v26 }
 0x1d7   :  { %1522 = vmatprep.mubr.bf16.mxu0 %v762_v57 }
 0x1de   :  { %1523 = vmatmul.mubr.bf16.gmra.mrb[84].mxu0 %v761_v52 }
 0x1df   :  { %1532 = vmatprep.mubr.bf16.mxu0 %v766_v61 }
 0x1e6   :  { %1533 = vmatmul.mubr.bf16.gmra.mrb[88].mxu0 %v765_v7 }
 0x1e7   :  { %1542 = vmatprep.mubr.bf16.mxu0 %v770_v21 }
 0x1ee   :  { %1543 = vmatmul.mubr.bf16.gmra.mrb[92].mxu0 %v769_v11 }
 0x249   :  { %v1394_v24 = vpop.f32.mrb[32].mxu0 }
 0x24a   :  { %v2502_v25 = vadd.f32 %v1394_v24, %v3389_v22  ;;  %v1396_v9 = vpop.f32.mrb[33].mxu0 }
 0x24b   :  { %v2503_v10 = vadd.f32 %v1396_v9, %v3393_v45  ;;  %v1398_v34 = vpop.f32.mrb[34].mxu0 }
 0x24c   :  { %v2504_v54 = vadd.f32 %v1398_v34, %v3389_v22  ;;  %v1400_v30 = vpop.f32.mrb[35].mxu0  ;;  %v1553_v51 = vmax.f32 %v2502_v25, 0.0 }
 0x24d   :  { %v2505_v8 = vadd.f32 %v1400_v30, %v3393_v45  ;;  %v1554_v19 = vmax.f32 %v2503_v10, 0.0 }
 0x24e   :  { %v1555_v23 = vmax.f32 %v2504_v54, 0.0 }
 0x24f   :  { %v1556_v4 = vmax.f32 %v2505_v8, 0.0 }
 0x250   :  { %v1617_v47 = vpack.c.bf16 %v1555_v23, %v1553_v51 }
 0x251   :  { %v1618_v15 = vpack.c.bf16 %v1556_v4, %v1554_v19  ;;  %v1404_v29 = vpop.f32.mrb[36].mxu0 }
 0x252   :  { %v2506_v0 = vadd.f32 %v1404_v29, %v3389_v22  ;;  %v1406_v27 = vpop.f32.mrb[37].mxu0 }
 0x253   :  { %v2507_v26 = vadd.f32 %v1406_v27, %v3393_v45  ;;  %v1408_v41 = vpop.f32.mrb[38].mxu0  ;;  %1816 = vmatprep.mubr.bf16.mxu1 %v1618_v15 }
 0x254   :  { %v2508_v53 = vadd.f32 %v1408_v41, %v3389_v22  ;;  %v1410_v28 = vpop.f32.mrb[39].mxu0  ;;  %1817 = vmatmul.mubr.bf16.vlgmr.msra.gmra.mrb[96].mxu1 %v1617_v47  ;;  %v1557_v33 = vmax.f32 %v2506_v0, 0.0 }
 0x255   :  { %v2509_v32 = vadd.f32 %v1410_v28, %v3393_v45  ;;  %v1558_v36 = vmax.f32 %v2507_v26, 0.0 }
 0x256   :  { %v1559_v35 = vmax.f32 %v2508_v53, 0.0 }
 0x257   :  { %v1560_v37 = vmax.f32 %v2509_v32, 0.0 }
 0x258   :  { %v1619_v39 = vpack.c.bf16 %v1559_v35, %v1557_v33 }
 0x259   :  { %v1620_v42 = vpack.c.bf16 %v1560_v37, %v1558_v36  ;;  %v1414_v48 = vpop.f32.mrb[40].mxu0 }
 0x25a   :  { %v2510_v43 = vadd.f32 %v1414_v48, %v3389_v22  ;;  %v1416_v44 = vpop.f32.mrb[41].mxu0 }
 0x25b   :  { %v2511_v52 = vadd.f32 %v1416_v44, %v3393_v45  ;;  %v1418_v57 = vpop.f32.mrb[42].mxu0  ;;  %1824 = vmatprep.mubr.bf16.mxu1 %v1620_v42 }
 0x25c   :  { %v2512_v3 = vadd.f32 %v1418_v57, %v3389_v22  ;;  %v1420_v6 = vpop.f32.mrb[43].mxu0  ;;  %1825 = vmatmul.mubr.bf16.gmra.mrb[100].mxu1 %v1619_v39  ;;  %v1561_v49 = vmax.f32 %v2510_v43, 0.0 }
 0x25d   :  { %v2513_v46 = vadd.f32 %v1420_v6, %v3393_v45  ;;  %v1562_v50 = vmax.f32 %v2511_v52, 0.0 }
 0x25e   :  { %v1563_v14 = vmax.f32 %v2512_v3, 0.0 }
 0x25f   :  { %v1564_v55 = vmax.f32 %v2513_v46, 0.0 }
 0x260   :  { %v1621_v56 = vpack.c.bf16 %v1563_v14, %v1561_v49 }
 0x261   :  { %v1622_v1 = vpack.c.bf16 %v1564_v55, %v1562_v50  ;;  %v1424_v58 = vpop.f32.mrb[44].mxu0 }
 0x262   :  { %v2514_v59 = vadd.f32 %v1424_v58, %v3389_v22  ;;  %v1426_v60 = vpop.f32.mrb[45].mxu0 }
 0x263   :  { %v2515_v7 = vadd.f32 %v1426_v60, %v3393_v45  ;;  %v1428_v61 = vpop.f32.mrb[46].mxu0  ;;  %1832 = vmatprep.mubr.bf16.mxu1 %v1622_v1 }
 0x264   :  { %v2516_v31 = vadd.f32 %v1428_v61, %v3389_v22  ;;  %v1430_v63 = vpop.f32.mrb[47].mxu0  ;;  %1833 = vmatmul.mubr.bf16.gmra.mrb[104].mxu1 %v1621_v56  ;;  %v1565_v2 = vmax.f32 %v2514_v59, 0.0 }
 0x265   :  { %v2517_v40 = vadd.f32 %v1430_v63, %v3393_v45  ;;  %v1566_v13 = vmax.f32 %v2515_v7, 0.0 }
 0x266   :  { %v1567_v5 = vmax.f32 %v2516_v31, 0.0 }
 0x267   :  { %v1568_v12 = vmax.f32 %v2517_v40, 0.0 }
 0x268   :  { %v1623_v38 = vpack.c.bf16 %v1567_v5, %v1565_v2 }
 0x269   :  { %v1624_v16 = vpack.c.bf16 %v1568_v12, %v1566_v13  ;;  %v1434_v17 = vpop.f32.mrb[48].mxu0 }
 0x26a   :  { %v2518_v18 = vadd.f32 %v1434_v17, %v3389_v22  ;;  %v1436_v62 = vpop.f32.mrb[49].mxu0 }
 0x26b   :  { %v2519_v11 = vadd.f32 %v1436_v62, %v3393_v45  ;;  %v1438_v21 = vpop.f32.mrb[50].mxu0  ;;  %1840 = vmatprep.mubr.bf16.mxu1 %v1624_v16 }
 0x26c   :  { %v2520_v20 = vadd.f32 %v1438_v21, %v3389_v22  ;;  %v1440_v24 = vpop.f32.mrb[51].mxu0  ;;  %1841 = vmatmul.mubr.bf16.gmra.mrb[108].mxu1 %v1623_v38  ;;  %v1569_v9 = vmax.f32 %v2518_v18, 0.0 }
 0x26d   :  { %v2521_v25 = vadd.f32 %v1440_v24, %v3393_v45  ;;  %v1570_v34 = vmax.f32 %v2519_v11, 0.0 }
 0x26e   :  { %v1571_v10 = vmax.f32 %v2520_v20, 0.0 }
 0x26f   :  { %v1572_v54 = vmax.f32 %v2521_v25, 0.0 }
 0x270   :  { %v1625_v30 = vpack.c.bf16 %v1571_v10, %v1569_v9 }
 0x271   :  { %v1626_v8 = vpack.c.bf16 %v1572_v54, %v1570_v34  ;;  %v1444_v51 = vpop.f32.mrb[52].mxu0 }
 0x272   :  { %v2522_v23 = vadd.f32 %v1444_v51, %v3389_v22  ;;  %v1446_v19 = vpop.f32.mrb[53].mxu0 }
 0x273   :  { %v2523_v4 = vadd.f32 %v1446_v19, %v3393_v45  ;;  %v1448_v47 = vpop.f32.mrb[54].mxu0  ;;  %1848 = vmatprep.mubr.bf16.mxu1 %v1626_v8 }
 0x274   :  { %v2524_v15 = vadd.f32 %v1448_v47, %v3389_v22  ;;  %v1450_v29 = vpop.f32.mrb[55].mxu0  ;;  %1849 = vmatmul.mubr.bf16.gmra.mrb[112].mxu1 %v1625_v30  ;;  %v1573_v27 = vmax.f32 %v2522_v23, 0.0 }
 0x275   :  { %v2525_v0 = vadd.f32 %v1450_v29, %v3393_v45  ;;  %v1574_v41 = vmax.f32 %v2523_v4, 0.0 }
 0x276   :  { %v1575_v26 = vmax.f32 %v2524_v15, 0.0 }
 0x277   :  { %v1576_v53 = vmax.f32 %v2525_v0, 0.0 }
 0x278   :  { %v1627_v28 = vpack.c.bf16 %v1575_v26, %v1573_v27 }
 0x279   :  { %v1628_v32 = vpack.c.bf16 %v1576_v53, %v1574_v41  ;;  %v1454_v33 = vpop.f32.mrb[56].mxu0 }
 0x27a   :  { %v2526_v35 = vadd.f32 %v1454_v33, %v3389_v22  ;;  %v1456_v36 = vpop.f32.mrb[57].mxu0 }
 0x27b   :  { %v2527_v37 = vadd.f32 %v1456_v36, %v3393_v45  ;;  %v1458_v39 = vpop.f32.mrb[58].mxu0  ;;  %1856 = vmatprep.mubr.bf16.mxu1 %v1628_v32 }
 0x27c   :  { %v2528_v42 = vadd.f32 %v1458_v39, %v3389_v22  ;;  %v1460_v48 = vpop.f32.mrb[59].mxu0  ;;  %1857 = vmatmul.mubr.bf16.gmra.mrb[116].mxu1 %v1627_v28  ;;  %v1577_v44 = vmax.f32 %v2526_v35, 0.0 }
 0x27d   :  { %v2529_v43 = vadd.f32 %v1460_v48, %v3393_v45  ;;  %v1578_v57 = vmax.f32 %v2527_v37, 0.0 }
 0x27e   :  { %v1579_v52 = vmax.f32 %v2528_v42, 0.0 }
 0x27f   :  { %v1580_v3 = vmax.f32 %v2529_v43, 0.0 }
 0x280   :  { %v1629_v6 = vpack.c.bf16 %v1579_v52, %v1577_v44 }
 0x281   :  { %v1630_v46 = vpack.c.bf16 %v1580_v3, %v1578_v57  ;;  %v1464_v49 = vpop.f32.mrb[60].mxu0 }
 0x282   :  { %v2530_v14 = vadd.f32 %v1464_v49, %v3389_v22  ;;  %v1466_v50 = vpop.f32.mrb[61].mxu0 }
 0x283   :  { %v2531_v55 = vadd.f32 %v1466_v50, %v3393_v45  ;;  %v1468_v56 = vpop.f32.mrb[62].mxu0  ;;  %1864 = vmatprep.mubr.bf16.mxu1 %v1630_v46 }
 0x284   :  { %v2532_v1 = vadd.f32 %v1468_v56, %v3389_v22  ;;  %v1470_v58 = vpop.f32.mrb[63].mxu0  ;;  %1865 = vmatmul.mubr.bf16.gmra.mrb[120].mxu1 %v1629_v6  ;;  %v1581_v60 = vmax.f32 %v2530_v14, 0.0 }
 0x285   :  { %v2533_v59 = vadd.f32 %v1470_v58, %v3393_v45  ;;  %v1582_v61 = vmax.f32 %v2531_v55, 0.0 }
 0x286   :  { %v1583_v7 = vmax.f32 %v2532_v1, 0.0 }
 0x287   :  { %v1584_v31 = vmax.f32 %v2533_v59, 0.0 }
 0x288   :  { %v1631_v63 = vpack.c.bf16 %v1583_v7, %v1581_v60 }
 0x289   :  { %v1632_v40 = vpack.c.bf16 %v1584_v31, %v1582_v61  ;;  %v1474_v2 = vpop.f32.mrb[64].mxu0 }
 0x28a   :  { %v2534_v5 = vadd.f32 %v1474_v2, %v3389_v22  ;;  %v1476_v13 = vpop.f32.mrb[65].mxu0 }
 0x28b   :  { %v2535_v12 = vadd.f32 %v1476_v13, %v3393_v45  ;;  %v1478_v38 = vpop.f32.mrb[66].mxu0  ;;  %1872 = vmatprep.mubr.bf16.mxu1 %v1632_v40 }
 0x28c   :  { %v2536_v16 = vadd.f32 %v1478_v38, %v3389_v22  ;;  %v1480_v17 = vpop.f32.mrb[67].mxu0  ;;  %1873 = vmatmul.mubr.bf16.gmra.mrb[124].mxu1 %v1631_v63  ;;  %v1585_v62 = vmax.f32 %v2534_v5, 0.0 }
 0x28d   :  { %v2537_v18 = vadd.f32 %v1480_v17, %v3393_v45  ;;  %v1586_v21 = vmax.f32 %v2535_v12, 0.0 }
 0x28e   :  { %v1587_v11 = vmax.f32 %v2536_v16, 0.0 }
 0x28f   :  { %v1588_v20 = vmax.f32 %v2537_v18, 0.0 }
 0x290   :  { %v1633_v24 = vpack.c.bf16 %v1587_v11, %v1585_v62 }
 0x291   :  { %v1634_v25 = vpack.c.bf16 %v1588_v20, %v1586_v21  ;;  %v1484_v9 = vpop.f32.mrb[68].mxu0 }
 0x292   :  { %v2538_v10 = vadd.f32 %v1484_v9, %v3389_v22  ;;  %v1486_v34 = vpop.f32.mrb[69].mxu0 }
 0x293   :  { %v2539_v54 = vadd.f32 %v1486_v34, %v3393_v45  ;;  %v1488_v30 = vpop.f32.mrb[70].mxu0  ;;  %1880 = vmatprep.mubr.bf16.mxu1 %v1634_v25 }
 0x294   :  { %v2540_v8 = vadd.f32 %v1488_v30, %v3389_v22  ;;  %v1490_v51 = vpop.f32.mrb[71].mxu0  ;;  %1881 = vmatmul.mubr.bf16.gmra.mrb[128].mxu1 %v1633_v24  ;;  %v1589_v19 = vmax.f32 %v2538_v10, 0.0 }
 0x295   :  { %v2541_v23 = vadd.f32 %v1490_v51, %v3393_v45  ;;  %v1590_v47 = vmax.f32 %v2539_v54, 0.0 }
 0x296   :  { %v1591_v4 = vmax.f32 %v2540_v8, 0.0 }
 0x297   :  { %v1592_v15 = vmax.f32 %v2541_v23, 0.0 }
 0x298   :  { %v1635_v29 = vpack.c.bf16 %v1591_v4, %v1589_v19 }
 0x299   :  { %v1636_v0 = vpack.c.bf16 %v1592_v15, %v1590_v47  ;;  %v1494_v27 = vpop.f32.mrb[72].mxu0 }
 0x29a   :  { %v2542_v26 = vadd.f32 %v1494_v27, %v3389_v22  ;;  %v1496_v41 = vpop.f32.mrb[73].mxu0 }
 0x29b   :  { %v2543_v53 = vadd.f32 %v1496_v41, %v3393_v45  ;;  %v1498_v28 = vpop.f32.mrb[74].mxu0  ;;  %1888 = vmatprep.mubr.bf16.mxu1 %v1636_v0 }
 0x29c   :  { %v2544_v32 = vadd.f32 %v1498_v28, %v3389_v22  ;;  %v1500_v33 = vpop.f32.mrb[75].mxu0  ;;  %1889 = vmatmul.mubr.bf16.gmra.mrb[132].mxu1 %v1635_v29  ;;  %v1593_v36 = vmax.f32 %v2542_v26, 0.0 }
 0x29d   :  { %v2545_v35 = vadd.f32 %v1500_v33, %v3393_v45  ;;  %v1594_v39 = vmax.f32 %v2543_v53, 0.0 }
 0x29e   :  { %v1595_v37 = vmax.f32 %v2544_v32, 0.0 }
 0x29f   :  { %v1596_v42 = vmax.f32 %v2545_v35, 0.0 }
 0x2a0   :  { %v1637_v48 = vpack.c.bf16 %v1595_v37, %v1593_v36 }
 0x2a1   :  { %v1638_v43 = vpack.c.bf16 %v1596_v42, %v1594_v39  ;;  %v1504_v44 = vpop.f32.mrb[76].mxu0 }
 0x2a2   :  { %v2546_v52 = vadd.f32 %v1504_v44, %v3389_v22  ;;  %v1506_v57 = vpop.f32.mrb[77].mxu0 }
 0x2a3   :  { %v2547_v3 = vadd.f32 %v1506_v57, %v3393_v45  ;;  %v1508_v6 = vpop.f32.mrb[78].mxu0  ;;  %1896 = vmatprep.mubr.bf16.mxu1 %v1638_v43 }
 0x2a4   :  { %v2548_v46 = vadd.f32 %v1508_v6, %v3389_v22  ;;  %v1510_v49 = vpop.f32.mrb[79].mxu0  ;;  %1897 = vmatmul.mubr.bf16.gmra.mrb[136].mxu1 %v1637_v48  ;;  %v1597_v50 = vmax.f32 %v2546_v52, 0.0 }
 0x2a5   :  { %v2549_v14 = vadd.f32 %v1510_v49, %v3393_v45  ;;  %v1598_v56 = vmax.f32 %v2547_v3, 0.0 }
 0x2a6   :  { %v1599_v55 = vmax.f32 %v2548_v46, 0.0 }
 0x2a7   :  { %v1600_v1 = vmax.f32 %v2549_v14, 0.0 }
 0x2a8   :  { %v1639_v58 = vpack.c.bf16 %v1599_v55, %v1597_v50 }
 0x2a9   :  { %v1640_v59 = vpack.c.bf16 %v1600_v1, %v1598_v56  ;;  %v1514_v60 = vpop.f32.mrb[80].mxu0 }
 0x2aa   :  { %v2550_v7 = vadd.f32 %v1514_v60, %v3389_v22  ;;  %v1516_v61 = vpop.f32.mrb[81].mxu0 }
 0x2ab   :  { %v2551_v31 = vadd.f32 %v1516_v61, %v3393_v45  ;;  %v1518_v63 = vpop.f32.mrb[82].mxu0  ;;  %1904 = vmatprep.mubr.bf16.mxu1 %v1640_v59 }
 0x2ac   :  { %v2552_v40 = vadd.f32 %v1518_v63, %v3389_v22  ;;  %v1520_v2 = vpop.f32.mrb[83].mxu0  ;;  %1905 = vmatmul.mubr.bf16.gmra.mrb[140].mxu1 %v1639_v58  ;;  %v1601_v13 = vmax.f32 %v2550_v7, 0.0 }
 0x2ad   :  { %v2553_v5 = vadd.f32 %v1520_v2, %v3393_v45  ;;  %v1602_v38 = vmax.f32 %v2551_v31, 0.0 }
 0x2ae   :  { %v1603_v12 = vmax.f32 %v2552_v40, 0.0 }
 0x2af   :  { %v1604_v16 = vmax.f32 %v2553_v5, 0.0 }
 0x2b0   :  { %v1641_v17 = vpack.c.bf16 %v1603_v12, %v1601_v13 }
 0x2b1   :  { %v1642_v18 = vpack.c.bf16 %v1604_v16, %v1602_v38  ;;  %v1524_v62 = vpop.f32.mrb[84].mxu0 }
 0x2b2   :  { %v2554_v11 = vadd.f32 %v1524_v62, %v3389_v22  ;;  %v1526_v21 = vpop.f32.mrb[85].mxu0 }
 0x2b3   :  { %v2555_v20 = vadd.f32 %v1526_v21, %v3393_v45  ;;  %v1528_v24 = vpop.f32.mrb[86].mxu0  ;;  %1912 = vmatprep.mubr.bf16.mxu1 %v1642_v18 }
 0x2b4   :  { %v2556_v25 = vadd.f32 %v1528_v24, %v3389_v22  ;;  %v1530_v9 = vpop.f32.mrb[87].mxu0  ;;  %1913 = vmatmul.mubr.bf16.gmra.mrb[144].mxu1 %v1641_v17  ;;  %v1605_v34 = vmax.f32 %v2554_v11, 0.0 }
 0x2b5   :  { %v2557_v10 = vadd.f32 %v1530_v9, %v3393_v45  ;;  %v1606_v30 = vmax.f32 %v2555_v20, 0.0 }
 0x2b6   :  { %v1607_v54 = vmax.f32 %v2556_v25, 0.0 }
 0x2b7   :  { %v1608_v8 = vmax.f32 %v2557_v10, 0.0 }
 0x2b8   :  { %v1643_v51 = vpack.c.bf16 %v1607_v54, %v1605_v34 }
 0x2b9   :  { %v1644_v23 = vpack.c.bf16 %v1608_v8, %v1606_v30  ;;  %v1534_v19 = vpop.f32.mrb[88].mxu0 }
 0x2ba   :  { %v2558_v4 = vadd.f32 %v1534_v19, %v3389_v22  ;;  %v1536_v47 = vpop.f32.mrb[89].mxu0 }
 0x2bb   :  { %v2559_v15 = vadd.f32 %v1536_v47, %v3393_v45  ;;  %v1538_v29 = vpop.f32.mrb[90].mxu0  ;;  %1920 = vmatprep.mubr.bf16.mxu1 %v1644_v23 }
 0x2bc   :  { %v2560_v0 = vadd.f32 %v1538_v29, %v3389_v22  ;;  %v1540_v27 = vpop.f32.mrb[91].mxu0  ;;  %1921 = vmatmul.mubr.bf16.gmra.mrb[148].mxu1 %v1643_v51  ;;  %v1609_v41 = vmax.f32 %v2558_v4, 0.0 }
 0x2bd   :  { %v2561_v26 = vadd.f32 %v1540_v27, %v3393_v45  ;;  %v1610_v28 = vmax.f32 %v2559_v15, 0.0 }
 0x2be   :  { %v1611_v53 = vmax.f32 %v2560_v0, 0.0 }
 0x2bf   :  { %v1612_v32 = vmax.f32 %v2561_v26, 0.0 }
 0x2c0   :  { %v1645_v33 = vpack.c.bf16 %v1611_v53, %v1609_v41 }
 0x2c1   :  { %v1646_v35 = vpack.c.bf16 %v1612_v32, %v1610_v28  ;;  %v1544_v36 = vpop.f32.mrb[92].mxu0 }
 0x2c2   :  { %v2562_v37 = vadd.f32 %v1544_v36, %v3389_v22  ;;  %v1546_v39 = vpop.f32.mrb[93].mxu0 }
 0x2c3   :  { %v2563_v42 = vadd.f32 %v1546_v39, %v3393_v45  ;;  %v1548_v48 = vpop.f32.mrb[94].mxu0  ;;  %1928 = vmatprep.mubr.bf16.mxu1 %v1646_v35 }
 0x2c4   :  { %v2564_v43 = vadd.f32 %v1548_v48, %v3389_v22  ;;  %v1550_v44 = vpop.f32.mrb[95].mxu0  ;;  %1929 = vmatmul.mubr.bf16.gmra.mrb[152].mxu1 %v1645_v33  ;;  %v1613_v57 = vmax.f32 %v2562_v37, 0.0  ;;  %v3462_v22 = vld [vmem:[%s3550_s6] ss:$0 sm:$0xff] }
 0x2c5   :  { %v2565_v52 = vadd.f32 %v1550_v44, %v3393_v45  ;;  %v1614_v6 = vmax.f32 %v2563_v42, 0.0 }
 0x2c6   :  { %v1615_v3 = vmax.f32 %v2564_v43, 0.0 }
 0x2c7   :  { %v1616_v46 = vmax.f32 %v2565_v52, 0.0 }
 0x2c8   :  { %v1647_v49 = vpack.c.bf16 %v1615_v3, %v1613_v57 }
 0x2c9   :  { %v1648_v14 = vpack.c.bf16 %v1616_v46, %v1614_v6 }
 0x2cb   :  { %1936 = vmatprep.mubr.bf16.mxu1 %v1648_v14 }
 0x2cc   :  { %1937 = vmatmul.mubr.bf16.gmra.mrb[156].mxu1 %v1647_v49 }
 0x327   :  { %v2404_v50 = vpop.f32.mrb[96].mxu1 }
 0x328   :  { %v2405_v55 = vpop.f32.mrb[97].mxu1 }
 0x329   :  { %v2406_v56 = vadd.f32 %v2405_v55, %v2404_v50  ;;  %v2407_v1 = vpop.f32.mrb[98].mxu1 }
 0x32a   :  { %v2408_v58 = vpop.f32.mrb[99].mxu1 }
 0x32b   :  { %v2409_v59 = vadd.f32 %v2408_v58, %v2407_v1  ;;  %v1819_v45 = vadd.f32 %v2406_v56, %v3462_v22 }
 0x32d   :  { %v1822_v60 = vadd.f32 %v2409_v59, %v3462_v22 }
 0x32f   :  { %v2296_v7 = vpack.c.bf16 %v1822_v60, %v1819_v45  ;;  %v2410_v61 = vpop.f32.mrb[100].mxu1 }
 0x330   :  { %v2411_v31 = vpop.f32.mrb[101].mxu1 }
 0x331   :  { %2297 = vst [vmem:[%s3551_s7] sm:$0xff] %v2296_v7   ;;  %v2412_v63 = vadd.f32 %v2411_v31, %v2410_v61  ;;  %v2413_v40 = vpop.f32.mrb[102].mxu1 }
 0x332   :  { %v2414_v2 = vpop.f32.mrb[103].mxu1 }
 0x333   :  { %v2415_v5 = vadd.f32 %v2414_v2, %v2413_v40  ;;  %v1827_v13 = vadd.f32 %v2412_v63, %v3462_v22 }
 0x335   :  { %v1830_v12 = vadd.f32 %v2415_v5, %v3462_v22 }
 0x337   :  { %v2301_v38 = vpack.c.bf16 %v1830_v12, %v1827_v13  ;;  %v2416_v16 = vpop.f32.mrb[104].mxu1 }
 0x338   :  { %v2417_v17 = vpop.f32.mrb[105].mxu1 }
 0x339   :  { %2373 = vst [vmem:[%s3551_s7 + $0x8] sm:$0xff] %v2301_v38   ;;  %v2418_v18 = vadd.f32 %v2417_v17, %v2416_v16  ;;  %v2419_v62 = vpop.f32.mrb[106].mxu1 }
 0x33a   :  { %v2420_v11 = vpop.f32.mrb[107].mxu1 }
 0x33b   :  { %v2421_v21 = vadd.f32 %v2420_v11, %v2419_v62  ;;  %v1835_v20 = vadd.f32 %v2418_v18, %v3462_v22 }
 0x33d   :  { %v1838_v24 = vadd.f32 %v2421_v21, %v3462_v22 }
 0x33f   :  { %v2306_v25 = vpack.c.bf16 %v1838_v24, %v1835_v20  ;;  %v2422_v9 = vpop.f32.mrb[108].mxu1 }
 0x340   :  { %v2423_v10 = vpop.f32.mrb[109].mxu1 }
 0x341   :  { %2374 = vst [vmem:[%s3551_s7 + $0x10] sm:$0xff] %v2306_v25   ;;  %v2424_v34 = vadd.f32 %v2423_v10, %v2422_v9  ;;  %v2425_v54 = vpop.f32.mrb[110].mxu1 }
 0x342   :  { %v2426_v30 = vpop.f32.mrb[111].mxu1 }
 0x343   :  { %v2427_v8 = vadd.f32 %v2426_v30, %v2425_v54  ;;  %v1843_v51 = vadd.f32 %v2424_v34, %v3462_v22 }
 0x345   :  { %v1846_v23 = vadd.f32 %v2427_v8, %v3462_v22 }
 0x347   :  { %v2311_v19 = vpack.c.bf16 %v1846_v23, %v1843_v51  ;;  %v2428_v4 = vpop.f32.mrb[112].mxu1 }
 0x348   :  { %v2429_v47 = vpop.f32.mrb[113].mxu1 }
 0x349   :  { %2375 = vst [vmem:[%s3551_s7 + $0x18] sm:$0xff] %v2311_v19   ;;  %v2430_v15 = vadd.f32 %v2429_v47, %v2428_v4  ;;  %v2431_v29 = vpop.f32.mrb[114].mxu1 }
 0x34a   :  { %v2432_v0 = vpop.f32.mrb[115].mxu1 }
 0x34b   :  { %v2433_v27 = vadd.f32 %v2432_v0, %v2431_v29  ;;  %v1851_v26 = vadd.f32 %v2430_v15, %v3462_v22 }
 0x34d   :  { %v1854_v41 = vadd.f32 %v2433_v27, %v3462_v22 }
 0x34f   :  { %v2316_v53 = vpack.c.bf16 %v1854_v41, %v1851_v26  ;;  %v2434_v28 = vpop.f32.mrb[116].mxu1 }
 0x350   :  { %v2435_v32 = vpop.f32.mrb[117].mxu1 }
 0x351   :  { %2376 = vst [vmem:[%s3551_s7 + $0x20] sm:$0xff] %v2316_v53   ;;  %v2436_v33 = vadd.f32 %v2435_v32, %v2434_v28  ;;  %v2437_v35 = vpop.f32.mrb[118].mxu1 }
 0x352   :  { %v2438_v36 = vpop.f32.mrb[119].mxu1 }
 0x353   :  { %v2439_v37 = vadd.f32 %v2438_v36, %v2437_v35  ;;  %v1859_v39 = vadd.f32 %v2436_v33, %v3462_v22 }
 0x355   :  { %v1862_v42 = vadd.f32 %v2439_v37, %v3462_v22 }
 0x357   :  { %v2321_v48 = vpack.c.bf16 %v1862_v42, %v1859_v39  ;;  %v2440_v43 = vpop.f32.mrb[120].mxu1 }
 0x358   :  { %v2441_v44 = vpop.f32.mrb[121].mxu1 }
 0x359   :  { %2377 = vst [vmem:[%s3551_s7 + $0x28] sm:$0xff] %v2321_v48   ;;  %v2442_v52 = vadd.f32 %v2441_v44, %v2440_v43  ;;  %v2443_v57 = vpop.f32.mrb[122].mxu1 }
 0x35a   :  { %v2444_v3 = vpop.f32.mrb[123].mxu1 }
 0x35b   :  { %v2445_v6 = vadd.f32 %v2444_v3, %v2443_v57  ;;  %v1867_v46 = vadd.f32 %v2442_v52, %v3462_v22 }
 0x35d   :  { %v1870_v49 = vadd.f32 %v2445_v6, %v3462_v22 }
 0x35f   :  { %v2326_v14 = vpack.c.bf16 %v1870_v49, %v1867_v46  ;;  %v2446_v50 = vpop.f32.mrb[124].mxu1 }
 0x360   :  { %v2447_v55 = vpop.f32.mrb[125].mxu1 }
 0x361   :  { %2378 = vst [vmem:[%s3551_s7 + $0x30] sm:$0xff] %v2326_v14   ;;  %v2448_v56 = vadd.f32 %v2447_v55, %v2446_v50  ;;  %v2449_v1 = vpop.f32.mrb[126].mxu1 }
 0x362   :  { %v2450_v58 = vpop.f32.mrb[127].mxu1 }
 0x363   :  { %v2451_v59 = vadd.f32 %v2450_v58, %v2449_v1  ;;  %v1875_v45 = vadd.f32 %v2448_v56, %v3462_v22 }
 0x365   :  { %v1878_v60 = vadd.f32 %v2451_v59, %v3462_v22 }
 0x367   :  { %v2331_v7 = vpack.c.bf16 %v1878_v60, %v1875_v45  ;;  %v2452_v61 = vpop.f32.mrb[128].mxu1 }
 0x368   :  { %v2453_v31 = vpop.f32.mrb[129].mxu1 }
 0x369   :  { %2379 = vst [vmem:[%s3551_s7 + $0x38] sm:$0xff] %v2331_v7   ;;  %v2454_v63 = vadd.f32 %v2453_v31, %v2452_v61  ;;  %v2455_v40 = vpop.f32.mrb[130].mxu1 }
 0x36a   :  { %v2456_v2 = vpop.f32.mrb[131].mxu1 }
 0x36b   :  { %v2457_v5 = vadd.f32 %v2456_v2, %v2455_v40  ;;  %v1883_v13 = vadd.f32 %v2454_v63, %v3462_v22 }
 0x36d   :  { %v1886_v12 = vadd.f32 %v2457_v5, %v3462_v22 }
 0x36f   :  { %v2336_v38 = vpack.c.bf16 %v1886_v12, %v1883_v13  ;;  %v2458_v16 = vpop.f32.mrb[132].mxu1 }
 0x370   :  { %v2459_v17 = vpop.f32.mrb[133].mxu1 }
 0x371   :  { %2380 = vst [vmem:[%s3551_s7 + $0x40] sm:$0xff] %v2336_v38   ;;  %v2460_v18 = vadd.f32 %v2459_v17, %v2458_v16  ;;  %v2461_v62 = vpop.f32.mrb[134].mxu1 }
 0x372   :  { %v2462_v11 = vpop.f32.mrb[135].mxu1 }
 0x373   :  { %v2463_v21 = vadd.f32 %v2462_v11, %v2461_v62  ;;  %v1891_v20 = vadd.f32 %v2460_v18, %v3462_v22 }
 0x375   :  { %v1894_v24 = vadd.f32 %v2463_v21, %v3462_v22 }
 0x377   :  { %v2341_v25 = vpack.c.bf16 %v1894_v24, %v1891_v20  ;;  %v2464_v9 = vpop.f32.mrb[136].mxu1 }
 0x378   :  { %v2465_v10 = vpop.f32.mrb[137].mxu1 }
 0x379   :  { %2381 = vst [vmem:[%s3551_s7 + $0x48] sm:$0xff] %v2341_v25   ;;  %v2466_v34 = vadd.f32 %v2465_v10, %v2464_v9  ;;  %v2467_v54 = vpop.f32.mrb[138].mxu1 }
 0x37a   :  { %v2468_v30 = vpop.f32.mrb[139].mxu1 }
 0x37b   :  { %v2469_v8 = vadd.f32 %v2468_v30, %v2467_v54  ;;  %v1899_v51 = vadd.f32 %v2466_v34, %v3462_v22 }
 0x37d   :  { %v1902_v23 = vadd.f32 %v2469_v8, %v3462_v22 }
 0x37f   :  { %v2346_v19 = vpack.c.bf16 %v1902_v23, %v1899_v51  ;;  %v2470_v4 = vpop.f32.mrb[140].mxu1 }
 0x380   :  { %v2471_v47 = vpop.f32.mrb[141].mxu1 }
 0x381   :  { %2382 = vst [vmem:[%s3551_s7 + $0x50] sm:$0xff] %v2346_v19   ;;  %v2472_v15 = vadd.f32 %v2471_v47, %v2470_v4  ;;  %v2473_v29 = vpop.f32.mrb[142].mxu1 }
 0x382   :  { %v2474_v0 = vpop.f32.mrb[143].mxu1 }
 0x383   :  { %v2475_v27 = vadd.f32 %v2474_v0, %v2473_v29  ;;  %v1907_v26 = vadd.f32 %v2472_v15, %v3462_v22 }
 0x385   :  { %v1910_v41 = vadd.f32 %v2475_v27, %v3462_v22 }
 0x387   :  { %v2351_v53 = vpack.c.bf16 %v1910_v41, %v1907_v26  ;;  %v2476_v28 = vpop.f32.mrb[144].mxu1 }
 0x388   :  { %v2477_v32 = vpop.f32.mrb[145].mxu1 }
 0x389   :  { %2383 = vst [vmem:[%s3551_s7 + $0x58] sm:$0xff] %v2351_v53   ;;  %v2478_v33 = vadd.f32 %v2477_v32, %v2476_v28  ;;  %v2479_v35 = vpop.f32.mrb[146].mxu1 }
 0x38a   :  { %v2480_v36 = vpop.f32.mrb[147].mxu1 }
 0x38b   :  { %v2481_v37 = vadd.f32 %v2480_v36, %v2479_v35  ;;  %v1915_v39 = vadd.f32 %v2478_v33, %v3462_v22 }
 0x38d   :  { %v1918_v42 = vadd.f32 %v2481_v37, %v3462_v22 }
 0x38f   :  { %v2356_v48 = vpack.c.bf16 %v1918_v42, %v1915_v39  ;;  %v2482_v43 = vpop.f32.mrb[148].mxu1 }
 0x390   :  { %v2483_v44 = vpop.f32.mrb[149].mxu1 }
 0x391   :  { %2384 = vst [vmem:[%s3551_s7 + $0x60] sm:$0xff] %v2356_v48   ;;  %v2484_v52 = vadd.f32 %v2483_v44, %v2482_v43  ;;  %v2485_v57 = vpop.f32.mrb[150].mxu1 }
 0x392   :  { %v2486_v3 = vpop.f32.mrb[151].mxu1 }
 0x393   :  { %v2487_v6 = vadd.f32 %v2486_v3, %v2485_v57  ;;  %v1923_v46 = vadd.f32 %v2484_v52, %v3462_v22 }
 0x395   :  { %v1926_v49 = vadd.f32 %v2487_v6, %v3462_v22 }
 0x397   :  { %v2361_v14 = vpack.c.bf16 %v1926_v49, %v1923_v46  ;;  %v2488_v50 = vpop.f32.mrb[152].mxu1 }
 0x398   :  { %v2489_v55 = vpop.f32.mrb[153].mxu1 }
 0x399   :  { %2385 = vst [vmem:[%s3551_s7 + $0x68] sm:$0xff] %v2361_v14   ;;  %v2490_v56 = vadd.f32 %v2489_v55, %v2488_v50  ;;  %v2491_v1 = vpop.f32.mrb[154].mxu1 }
 0x39a   :  { %v2492_v58 = vpop.f32.mrb[155].mxu1 }
 0x39b   :  { %v2493_v59 = vadd.f32 %v2492_v58, %v2491_v1  ;;  %v1931_v45 = vadd.f32 %v2490_v56, %v3462_v22 }
 0x39d   :  { %v1934_v60 = vadd.f32 %v2493_v59, %v3462_v22 }
 0x39f   :  { %v2366_v7 = vpack.c.bf16 %v1934_v60, %v1931_v45  ;;  %v2494_v61 = vpop.f32.mrb[156].mxu1 }
 0x3a0   :  { %v2495_v31 = vpop.f32.mrb[157].mxu1 }
 0x3a1   :  { %2386 = vst [vmem:[%s3551_s7 + $0x70] sm:$0xff] %v2366_v7   ;;  %v2496_v63 = vadd.f32 %v2495_v31, %v2494_v61  ;;  %v2497_v40 = vpop.f32.mrb[158].mxu1 }
 0x3a2   :  { %v2498_v2 = vpop.f32.mrb[159].mxu1 }
 0x3a3   :  { %v2499_v5 = vadd.f32 %v2498_v2, %v2497_v40  ;;  %v1939_v13 = vadd.f32 %v2496_v63, %v3462_v22 }
 0x3a5   :  { %v1942_v12 = vadd.f32 %v2499_v5, %v3462_v22 }
 0x3a7   :  { %v2371_v38 = vpack.c.bf16 %v1942_v12, %v1939_v13 }
 0x3a9   :  { %2387 = vst [vmem:[%s3551_s7 + $0x78] sm:$0xff] %v2371_v38  }
 0x3aa   :  { %2109 = vsyncpa [#allocation3], 1 }

</bundles_post_ra>
